<compile_context>
chip_gen: v6e
topology: v6e:2x2x1
jax: 0.10.0
libtpu: 0.0.40
codegen_flags: <defaults>
</compile_context>

<pallas_src>
import functools
import math

import jax
import jax.numpy as jnp
from jax.experimental import pallas as pl
from jax.experimental.pallas import tpu as pltpu


def _round_up(x, m):
    return ((x + m - 1) // m) * m


# --------------------------------------------------------------------------- #
# Kernel 1: gated activations (projection + ELU / ReLU / exp attention gate).
# Runs once per node row; output is the bf16 operand of the aggregation.
# --------------------------------------------------------------------------- #
def _gating_kernel(f_pad, gamma_ref, x_ref, w_ref, gmu_ref, gsig_ref):
    gamma = gamma_ref[0, 0]
    # [miu | sigma] @ blockdiag(W_mu, W_sigma) -> [miu_h | sigma_h]  (bf16 MXU)
    h = jnp.dot(x_ref[...], w_ref[...], preferred_element_type=jnp.float32)
    miu_h = h[:, :f_pad]
    sigma_h = jnp.maximum(h[:, f_pad:], 0.0)
    # ELU (alpha = 1); clamp before exp so the discarded branch never overflows.
    miu_h = jnp.where(miu_h > 0.0, miu_h,
                      jnp.exp(jnp.minimum(miu_h, 0.0)) - 1.0)
    att = jnp.exp(-gamma * sigma_h)
    gmu_ref[...] = (miu_h * att).astype(gmu_ref.dtype)
    gsig_ref[...] = (sigma_h * att * att).astype(gsig_ref.dtype)


# --------------------------------------------------------------------------- #
# Kernel 2: aggregation  mean = adj1 @ gated_mu,  sigma = adj2 @ gated_sig.
# Accumulates straight into the f32 output blocks (resident across k).
# --------------------------------------------------------------------------- #
def _agg_kernel(adj1_ref, adj2_ref, gmu_ref, gsig_ref, mean_ref, sigma_ref):
    k = pl.program_id(1)

    @pl.when(k == 0)
    def _init():
        mean_ref[...] = jnp.zeros_like(mean_ref)
        sigma_ref[...] = jnp.zeros_like(sigma_ref)

    mean_ref[...] += jnp.dot(adj1_ref[...], gmu_ref[...],
                             preferred_element_type=jnp.float32)
    sigma_ref[...] += jnp.dot(adj2_ref[...], gsig_ref[...],
                              preferred_element_type=jnp.float32)


def ggcl_d_forward(miu, sigma, adj_norm1, adj_norm2, weight_miu, weight_sigma,
                   gamma=1.0, *, tile_m=512, tile_k=512,
                   agg_dtype=jnp.bfloat16):
    """Eval-mode GGCL_D forward.  Returns (mean_out, sigma_out), f32 (N, F_out)."""
    # TODO(synk): training-mode dropout (pltpu.prng_random_bits mask on
    # miu/sigma) and the generation-specific fp8 (v7x) / int8 (v5e,v6e)
    # adjacency paths are not implemented; eval mode + bf16 aggregation only.
    N, f_in = miu.shape
    f_out = weight_miu.shape[1]
    f_pad = max(128, _round_up(f_out, 128))            # lane-dense outputs

    # ---- tile selection ---------------------------------------------------
    tile_m = max(256, (int(tile_m) // 256) * 256)
    tile_k = max(256, (int(tile_k) // 256) * 256)
    tile_m = min(tile_m, _round_up(N, 256))
    tile_k = min(tile_k, _round_up(N, 256))
    # v7x megacore: keep >= 2 blocks on the "parallel" row axis when N allows.
    while tile_m > 256 and _round_up(N, tile_m) // tile_m < 2:
        tile_m -= 256

    n_rows = _round_up(N, tile_m)                      # aggregation output rows
    n_cols = _round_up(N, tile_k)                      # aggregation reduction dim

    # ---- operand packing / padding -----------------------------------------
    # [miu | sigma] packed along features; bf16 for the projection MXU matmul.
    x = jnp.concatenate([miu, sigma], axis=1).astype(jnp.bfloat16)
    if n_cols != N:
        x = jnp.pad(x, ((0, n_cols - N), (0, 0)))

    # Block-diagonal, lane-padded weight: (2*F_in, 2*F_pad), bf16.
    w = jnp.zeros((2 * f_in, 2 * f_pad), jnp.float32)
    w = w.at[:f_in, :f_out].set(weight_miu.astype(jnp.float32))
    w = w.at[f_in:, f_pad:f_pad + f_out].set(weight_sigma.astype(jnp.float32))
    w = w.astype(jnp.bfloat16)

    gamma_arr = jnp.full((1, 1), gamma, jnp.float32)   # SMEM scalar, no retrace

    def pad_adj(a):
        a = a.astype(agg_dtype)
        if (n_rows, n_cols) != a.shape:
            a = jnp.pad(a, ((0, n_rows - N), (0, n_cols - N)))
        return a

    adj1 = pad_adj(adj_norm1)
    adj2 = pad_adj(adj_norm2)
    adj_bytes = jnp.dtype(agg_dtype).itemsize

    # ---- kernel 1: gated activations (once per node) ------------------------
    grid_g = n_cols // tile_k
    gated_mu, gated_sig = pl.pallas_call(
        functools.partial(_gating_kernel, f_pad),
        out_shape=(jax.ShapeDtypeStruct((n_cols, f_pad), agg_dtype),
                   jax.ShapeDtypeStruct((n_cols, f_pad), agg_dtype)),
        grid_spec=pltpu.PrefetchScalarGridSpec(
            num_scalar_prefetch=0,
            grid=(grid_g,),
            in_specs=[
                pl.BlockSpec(memory_space=pltpu.MemorySpace.SMEM),       # gamma
                pl.BlockSpec((tile_k, 2 * f_in), lambda i: (i, 0)),      # x
                pl.BlockSpec((2 * f_in, 2 * f_pad), lambda i: (0, 0)),   # weights
            ],
            out_specs=(pl.BlockSpec((tile_k, f_pad), lambda i: (i, 0)),
                       pl.BlockSpec((tile_k, f_pad), lambda i: (i, 0))),
        ),
        compiler_params=pltpu.CompilerParams(
            dimension_semantics=("parallel",)),
        cost_estimate=pl.CostEstimate(
            flops=int(2 * n_cols * (2 * f_in) * (2 * f_pad)),
            transcendentals=int(2 * n_cols * f_pad),
            bytes_accessed=int(n_cols * 2 * f_in * 2
                               + grid_g * (2 * f_in) * (2 * f_pad) * 2
                               + 2 * n_cols * f_pad * adj_bytes)),
    )(gamma_arr, x, w)

    # ---- kernel 2: tiled aggregation ----------------------------------------
    grid = (n_rows // tile_m, n_cols // tile_k)
    flops = 4 * n_rows * n_cols * f_pad
    bytes_accessed = (2 * n_rows * n_cols * adj_bytes            # adj1 + adj2
                      + grid[0] * 2 * n_cols * f_pad * adj_bytes  # gated re-read
                      + 2 * n_rows * f_pad * 4)                   # f32 outputs

    mean_p, sigma_p = pl.pallas_call(
        _agg_kernel,
        out_shape=(jax.ShapeDtypeStruct((n_rows, f_pad), jnp.float32),
                   jax.ShapeDtypeStruct((n_rows, f_pad), jnp.float32)),
        grid_spec=pltpu.PrefetchScalarGridSpec(
            num_scalar_prefetch=0,
            grid=grid,
            in_specs=[
                pl.BlockSpec((tile_m, tile_k), lambda i, k: (i, k)),   # adj1
                pl.BlockSpec((tile_m, tile_k), lambda i, k: (i, k)),   # adj2
                pl.BlockSpec((tile_k, f_pad), lambda i, k: (k, 0)),    # gated_mu
                pl.BlockSpec((tile_k, f_pad), lambda i, k: (k, 0)),    # gated_sig
            ],
            out_specs=(pl.BlockSpec((tile_m, f_pad), lambda i, k: (i, 0)),
                       pl.BlockSpec((tile_m, f_pad), lambda i, k: (i, 0))),
        ),
        compiler_params=pltpu.CompilerParams(
            dimension_semantics=("parallel", "arbitrary"),
            vmem_limit_bytes=48 * 1024 * 1024,
        ),
        cost_estimate=pl.CostEstimate(
            flops=int(flops),
            transcendentals=0,
            bytes_accessed=int(bytes_accessed)),
    )(adj1, adj2, gated_mu, gated_sig)

    return mean_p[:N, :f_out], sigma_p[:N, :f_out]


def xavier_uniform(key, fan_in, fan_out):
    limit = math.sqrt(6.0 / (fan_in + fan_out))
    return jax.random.uniform(key, (fan_in, fan_out), jnp.float32, -limit, limit)


def reference_forward(miu, sigma, adj1, adj2, wm, ws, gamma=1.0,
                      proj_dtype=jnp.float32, agg_dtype=jnp.float32):
    miu_h = jnp.dot(miu.astype(proj_dtype), wm.astype(proj_dtype),
                    preferred_element_type=jnp.float32)
    sigma_h = jnp.maximum(
        jnp.dot(sigma.astype(proj_dtype), ws.astype(proj_dtype),
                preferred_element_type=jnp.float32), 0.0)
    miu_h = jnp.where(miu_h > 0.0, miu_h,
                      jnp.exp(jnp.minimum(miu_h, 0.0)) - 1.0)
    att = jnp.exp(-gamma * sigma_h)
    gm = (miu_h * att).astype(agg_dtype)
    gs = (sigma_h * att * att).astype(agg_dtype)
    m = jnp.dot(adj1.astype(agg_dtype), gm, preferred_element_type=jnp.float32)
    s = jnp.dot(adj2.astype(agg_dtype), gs, preferred_element_type=jnp.float32)
    return m, s


if __name__ == "__main__":
    # Small, module-consistent shapes: N nodes, in_features, out_features.
    N, F_IN, F_OUT = 64, 32, 16
    key = jax.random.PRNGKey(0)
    k_mu, k_sig, k_a1, k_a2, k_wm, k_ws = jax.random.split(key, 6)

    miu = jax.random.normal(k_mu, (N, F_IN), jnp.float32)
    sigma = jax.nn.softplus(jax.random.normal(k_sig, (N, F_IN), jnp.float32))
    adj_norm1 = jax.random.uniform(k_a1, (N, N), jnp.float32) / N
    adj_norm2 = jax.random.uniform(k_a2, (N, N), jnp.float32) / N

    # Deterministic xavier_uniform parameter init (as in reset_parameters()).
    weight_miu = xavier_uniform(k_wm, F_IN, F_OUT)
    weight_sigma = xavier_uniform(k_ws, F_IN, F_OUT)

    fwd = jax.jit(ggcl_d_forward)
    mean_out, sigma_out = fwd(miu, sigma, adj_norm1, adj_norm2,
                              weight_miu, weight_sigma)
    jax.block_until_ready((mean_out, sigma_out))

    # Precision-matched reference (bf16 projection / adjacency, f32 accumulate).
    ref_m_bf, ref_s_bf = reference_forward(
        miu, sigma, adj_norm1, adj_norm2, weight_miu, weight_sigma, gamma=1.0,
        proj_dtype=jnp.bfloat16, agg_dtype=jnp.bfloat16)
    assert jnp.allclose(mean_out, ref_m_bf, atol=2e-2, rtol=2e-2), "mean (bf16 ref)"
    assert jnp.allclose(sigma_out, ref_s_bf, atol=2e-2, rtol=2e-2), "sigma (bf16 ref)"

    # Looser check against the full-f32 reference semantics.
    ref_m_f32, ref_s_f32 = reference_forward(
        miu, sigma, adj_norm1, adj_norm2, weight_miu, weight_sigma, gamma=1.0)
    assert jnp.allclose(mean_out, ref_m_f32, atol=5e-2, rtol=5e-2), "mean (f32 ref)"
    assert jnp.allclose(sigma_out, ref_s_f32, atol=5e-2, rtol=5e-2), "sigma (f32 ref)"

    print("KERNEL_OK")
</pallas_src>

<mosaic_0001>
module attributes {stable_mosaic.version = 11 : i64} {
  func.func @_gating_kernel(%arg0: i32, %arg1: memref<1x1xf32, #tpu.memory_space<smem>>, %arg2: memref<256x64xbf16, #tpu.memory_space<vmem>>, %arg3: memref<64x256xbf16, #tpu.memory_space<vmem>>, %arg4: memref<256x128xbf16, #tpu.memory_space<vmem>>, %arg5: memref<256x128xbf16, #tpu.memory_space<vmem>>) attributes {dimension_semantics = [#tpu.dimension_semantics<parallel>], iteration_bounds = array<i64: 1>, scalar_prefetch = 0 : i64, scratch_operands = 0 : i64, tpu.core_type = #tpu.core_type<tc>, window_params = [{transform_indices = @transform_0, window_bounds = array<i64: 1, 1>}, {transform_indices = @transform_1, window_bounds = array<i64: 256, 64>}, {pipeline_mode = #tpu.pipeline_mode<synchronous>, transform_indices = @transform_2, window_bounds = array<i64: 64, 256>}, {transform_indices = @transform_3, window_bounds = array<i64: 256, 128>}, {transform_indices = @transform_4, window_bounds = array<i64: 256, 128>}]} {
    %c0 = arith.constant 0 : index
    %c0_0 = arith.constant 0 : index
    %0 = memref.load %arg1[%c0, %c0_0] : memref<1x1xf32, #tpu.memory_space<smem>>
    %c0_1 = arith.constant 0 : index
    %c0_2 = arith.constant 0 : index
    %1 = vector.load %arg2[%c0_1, %c0_2] : memref<256x64xbf16, #tpu.memory_space<vmem>>, vector<256x64xbf16>
    %c0_3 = arith.constant 0 : index
    %c0_4 = arith.constant 0 : index
    %2 = vector.load %arg3[%c0_3, %c0_4] : memref<64x256xbf16, #tpu.memory_space<vmem>>, vector<64x256xbf16>
    %cst = arith.constant dense<0.000000e+00> : vector<256x256xf32>
    %3 = tpu.matmul %1, %2, %cst {dimension_numbers = #tpu.dot_dimension_numbers<[1], [0], [0], [1], [0, 0, 1, 1], [], []>} : vector<256x64xbf16>, vector<64x256xbf16>, vector<256x256xf32> -> vector<256x256xf32>
    %4 = vector.extract_strided_slice %3 {offsets = [0, 0], sizes = [256, 128], strides = [1, 1]} : vector<256x256xf32> to vector<256x128xf32>
    %5 = vector.extract_strided_slice %3 {offsets = [0, 128], sizes = [256, 128], strides = [1, 1]} : vector<256x256xf32> to vector<256x128xf32>
    %cst_5 = arith.constant 0.000000e+00 : f32
    %6 = vector.broadcast %cst_5 : f32 to vector<256x128xf32>
    %7 = arith.maximumf %5, %6 : vector<256x128xf32>
    %cst_6 = arith.constant 0.000000e+00 : f32
    %8 = vector.broadcast %cst_6 : f32 to vector<256x128xf32>
    %9 = arith.cmpf ogt, %4, %8 : vector<256x128xf32>
    %cst_7 = arith.constant 0.000000e+00 : f32
    %10 = vector.broadcast %cst_7 : f32 to vector<256x128xf32>
    %11 = arith.minimumf %4, %10 : vector<256x128xf32>
    %12 = math.exp %11 : vector<256x128xf32>
    %cst_8 = arith.constant 1.000000e+00 : f32
    %13 = vector.broadcast %cst_8 : f32 to vector<256x128xf32>
    %14 = arith.subf %12, %13 : vector<256x128xf32>
    %15 = arith.select %9, %4, %14 : vector<256x128xi1>, vector<256x128xf32>
    %cst_9 = arith.constant 0.000000e+00 : f32
    %16 = arith.subf %cst_9, %0 : f32
    %17 = vector.broadcast %16 : f32 to vector<256x128xf32>
    %18 = arith.mulf %17, %7 : vector<256x128xf32>
    %19 = math.exp %18 : vector<256x128xf32>
    %20 = arith.mulf %15, %19 : vector<256x128xf32>
    %21 = arith.truncf %20 : vector<256x128xf32> to vector<256x128xbf16>
    %c0_10 = arith.constant 0 : index
    %c0_11 = arith.constant 0 : index
    %22 = vector.load %arg4[%c0_10, %c0_11] : memref<256x128xbf16, #tpu.memory_space<vmem>>, vector<256x128xbf16>
    tpu.vector_store %arg4[%c0_10, %c0_11], %21 {strides = array<i32>} : memref<256x128xbf16, #tpu.memory_space<vmem>>, vector<256x128xbf16>,
    %23 = arith.mulf %7, %19 : vector<256x128xf32>
    %24 = arith.mulf %23, %19 : vector<256x128xf32>
    %25 = arith.truncf %24 : vector<256x128xf32> to vector<256x128xbf16>
    %c0_12 = arith.constant 0 : index
    %c0_13 = arith.constant 0 : index
    %26 = vector.load %arg5[%c0_12, %c0_13] : memref<256x128xbf16, #tpu.memory_space<vmem>>, vector<256x128xbf16>
    tpu.vector_store %arg5[%c0_12, %c0_13], %25 {strides = array<i32>} : memref<256x128xbf16, #tpu.memory_space<vmem>>, vector<256x128xbf16>,
    return
  }
  func.func @transform_0(%arg0: i32) -> (i32, i32) {
    %c0_i32 = arith.constant 0 : i32
    %c0_i32_0 = arith.constant 0 : i32
    %c0_i32_1 = arith.constant 0 : i32
    return %c0_i32, %c0_i32_0 : i32, i32
  }
  func.func @transform_1(%arg0: i32) -> (i32, i32) {
    %c0_i32 = arith.constant 0 : i32
    %c0_i32_0 = arith.constant 0 : i32
    return %arg0, %c0_i32 : i32, i32
  }
  func.func @transform_2(%arg0: i32) -> (i32, i32) {
    %c0_i32 = arith.constant 0 : i32
    %c0_i32_0 = arith.constant 0 : i32
    %c0_i32_1 = arith.constant 0 : i32
    return %c0_i32, %c0_i32_0 : i32, i32
  }
  func.func @transform_3(%arg0: i32) -> (i32, i32) {
    %c0_i32 = arith.constant 0 : i32
    %c0_i32_0 = arith.constant 0 : i32
    return %arg0, %c0_i32 : i32, i32
  }
  func.func @transform_4(%arg0: i32) -> (i32, i32) {
    %c0_i32 = arith.constant 0 : i32
    %c0_i32_0 = arith.constant 0 : i32
    return %arg0, %c0_i32 : i32, i32
  }
}

module attributes {stable_mosaic.version = 11 : i64} {
  func.func @_agg_kernel(%arg0: i32, %arg1: i32, %arg2: memref<256x256xbf16, #tpu.memory_space<vmem>>, %arg3: memref<256x256xbf16, #tpu.memory_space<vmem>>, %arg4: memref<256x128xbf16, #tpu.memory_space<vmem>>, %arg5: memref<256x128xbf16, #tpu.memory_space<vmem>>, %arg6: memref<256x128xf32, #tpu.memory_space<vmem>>, %arg7: memref<256x128xf32, #tpu.memory_space<vmem>>) attributes {dimension_semantics = [#tpu.dimension_semantics<parallel>, #tpu.dimension_semantics<arbitrary>], iteration_bounds = array<i64: 1, 1>, scalar_prefetch = 0 : i64, scratch_operands = 0 : i64, tpu.core_type = #tpu.core_type<tc>, window_params = [{transform_indices = @transform_0, window_bounds = array<i64: 256, 256>}, {transform_indices = @transform_1, window_bounds = array<i64: 256, 256>}, {transform_indices = @transform_2, window_bounds = array<i64: 256, 128>}, {transform_indices = @transform_3, window_bounds = array<i64: 256, 128>}, {transform_indices = @transform_4, window_bounds = array<i64: 256, 128>}, {transform_indices = @transform_5, window_bounds = array<i64: 256, 128>}]} {
    %c0_i32 = arith.constant 0 : i32
    %0 = arith.cmpi eq, %arg1, %c0_i32 : i32
    %1 = arith.extui %0 : i1 to i32
    %c0_i32_0 = arith.constant 0 : i32
    %2 = arith.cmpi ne, %1, %c0_i32_0 : i32
    scf.if %2 {
      %cst_17 = arith.constant 0.000000e+00 : f32
      %15 = vector.broadcast %cst_17 : f32 to vector<256x128xf32>
      %c0_18 = arith.constant 0 : index
      %c0_19 = arith.constant 0 : index
      %16 = vector.load %arg6[%c0_18, %c0_19] : memref<256x128xf32, #tpu.memory_space<vmem>>, vector<256x128xf32>
      tpu.vector_store %arg6[%c0_18, %c0_19], %15 {strides = array<i32>} : memref<256x128xf32, #tpu.memory_space<vmem>>, vector<256x128xf32>,
      %cst_20 = arith.constant 0.000000e+00 : f32
      %17 = vector.broadcast %cst_20 : f32 to vector<256x128xf32>
      %c0_21 = arith.constant 0 : index
      %c0_22 = arith.constant 0 : index
      %18 = vector.load %arg7[%c0_21, %c0_22] : memref<256x128xf32, #tpu.memory_space<vmem>>, vector<256x128xf32>
      tpu.vector_store %arg7[%c0_21, %c0_22], %17 {strides = array<i32>} : memref<256x128xf32, #tpu.memory_space<vmem>>, vector<256x128xf32>,
    } else {
    }
    %c0 = arith.constant 0 : index
    %c0_1 = arith.constant 0 : index
    %3 = vector.load %arg6[%c0, %c0_1] : memref<256x128xf32, #tpu.memory_space<vmem>>, vector<256x128xf32>
    %c0_2 = arith.constant 0 : index
    %c0_3 = arith.constant 0 : index
    %4 = vector.load %arg2[%c0_2, %c0_3] : memref<256x256xbf16, #tpu.memory_space<vmem>>, vector<256x256xbf16>
    %c0_4 = arith.constant 0 : index
    %c0_5 = arith.constant 0 : index
    %5 = vector.load %arg4[%c0_4, %c0_5] : memref<256x128xbf16, #tpu.memory_space<vmem>>, vector<256x128xbf16>
    %cst = arith.constant dense<0.000000e+00> : vector<256x128xf32>
    %6 = tpu.matmul %4, %5, %cst {dimension_numbers = #tpu.dot_dimension_numbers<[1], [0], [0], [1], [0, 0, 1, 1], [], []>} : vector<256x256xbf16>, vector<256x128xbf16>, vector<256x128xf32> -> vector<256x128xf32>
    %7 = arith.addf %3, %6 : vector<256x128xf32>
    %c0_6 = arith.constant 0 : index
    %c0_7 = arith.constant 0 : index
    %8 = vector.load %arg6[%c0_6, %c0_7] : memref<256x128xf32, #tpu.memory_space<vmem>>, vector<256x128xf32>
    tpu.vector_store %arg6[%c0_6, %c0_7], %7 {strides = array<i32>} : memref<256x128xf32, #tpu.memory_space<vmem>>, vector<256x128xf32>,
    %c0_8 = arith.constant 0 : index
    %c0_9 = arith.constant 0 : index
    %9 = vector.load %arg7[%c0_8, %c0_9] : memref<256x128xf32, #tpu.memory_space<vmem>>, vector<256x128xf32>
    %c0_10 = arith.constant 0 : index
    %c0_11 = arith.constant 0 : index
    %10 = vector.load %arg3[%c0_10, %c0_11] : memref<256x256xbf16, #tpu.memory_space<vmem>>, vector<256x256xbf16>
    %c0_12 = arith.constant 0 : index
    %c0_13 = arith.constant 0 : index
    %11 = vector.load %arg5[%c0_12, %c0_13] : memref<256x128xbf16, #tpu.memory_space<vmem>>, vector<256x128xbf16>
    %cst_14 = arith.constant dense<0.000000e+00> : vector<256x128xf32>
    %12 = tpu.matmul %10, %11, %cst_14 {dimension_numbers = #tpu.dot_dimension_numbers<[1], [0], [0], [1], [0, 0, 1, 1], [], []>} : vector<256x256xbf16>, vector<256x128xbf16>, vector<256x128xf32> -> vector<256x128xf32>
    %13 = arith.addf %9, %12 : vector<256x128xf32>
    %c0_15 = arith.constant 0 : index
    %c0_16 = arith.constant 0 : index
    %14 = vector.load %arg7[%c0_15, %c0_16] : memref<256x128xf32, #tpu.memory_space<vmem>>, vector<256x128xf32>
    tpu.vector_store %arg7[%c0_15, %c0_16], %13 {strides = array<i32>} : memref<256x128xf32, #tpu.memory_space<vmem>>, vector<256x128xf32>,
    return
  }
  func.func @transform_0(%arg0: i32, %arg1: i32) -> (i32, i32) {
    %c0_i32 = arith.constant 0 : i32
    return %arg0, %arg1 : i32, i32
  }
  func.func @transform_1(%arg0: i32, %arg1: i32) -> (i32, i32) {
    %c0_i32 = arith.constant 0 : i32
    return %arg0, %arg1 : i32, i32
  }
  func.func @transform_2(%arg0: i32, %arg1: i32) -> (i32, i32) {
    %c0_i32 = arith.constant 0 : i32
    %c0_i32_0 = arith.constant 0 : i32
    return %arg1, %c0_i32 : i32, i32
  }
  func.func @transform_3(%arg0: i32, %arg1: i32) -> (i32, i32) {
    %c0_i32 = arith.constant 0 : i32
    %c0_i32_0 = arith.constant 0 : i32
    return %arg1, %c0_i32 : i32, i32
  }
  func.func @transform_4(%arg0: i32, %arg1: i32) -> (i32, i32) {
    %c0_i32 = arith.constant 0 : i32
    %c0_i32_0 = arith.constant 0 : i32
    return %arg0, %c0_i32 : i32, i32
  }
  func.func @transform_5(%arg0: i32, %arg1: i32) -> (i32, i32) {
    %c0_i32 = arith.constant 0 : i32
    %c0_i32_0 = arith.constant 0 : i32
    return %arg0, %c0_i32 : i32, i32
  }
}

</mosaic_0001>

<bundles_post_ra>
// kernel: ggcl_d_forward.2
= control target key start
LH: loop header
LB: loop body
LE: loop exit
PB: predicated region body
PF: predicated region fallthrough
CT: control target
= control target key end

     0   :  { %v1722_v1 = vmov 0   ;;  %vm179_vm0 = vcmask 523264   ;;  %s2413_s2 = inlined_call_operand.vmem [shape: bf16[64,256], index: 2, kind: input, shape index: {}]   ;;  %s2414_s1 = inlined_call_operand.vmem [shape: bf16[256,64], index: 1, kind: input, shape index: {}]   ;;  %s2415_s0 = inlined_call_operand.<no memory space> [shape: f32[1,1], index: 0, kind: input, shape index: {}]   ;;  %s2416_s3 = inlined_call_operand.vmem [shape: bf16[256,128], index: 3, kind: output, shape index: {0}]   ;;  %s2417_s4 = inlined_call_operand.vmem [shape: bf16[256,128], index: 4, kind: output, shape index: {1}]  }
   0x1   :  { %v1566_v0 = vld [vmem:[%s2413_s2 + $0x34] ss:$8 sps:$4 sm:$0xff]   ;;  %260 = vmatprep.mubr.bf16.mxu0 %v1722_v1  ;;  %340 = vmatprep.mubr.bf16.mxu1 %v1722_v1  ;;  %v1568_v2 = vld [vmem:[%s2413_s2 + $0x30] ss:$8 sps:$4 sm:$0xff]   ;;  %v1569_v3 = vld [vmem:[%s2413_s2 + $0x24] ss:$8 sps:$4 sm:$0xff]  }
   0x2   :  { %236 = vmatprep.subr.bf16.mxu0 %v1566_v0  ;;  %1557 = vmatprep.subr.bf16.mxu1 %v1566_v0  ;;  %v1571_v4 = vld [vmem:[%s2413_s2 + $0x20] ss:$8 sps:$4 sm:$0xff]   ;;  %v1572_v5 = vld [vmem:[%s2413_s2 + $0x14] ss:$8 sps:$4 sm:$0xff]   ;;  %v1574_v6 = vld [vmem:[%s2413_s2 + $0x10] ss:$8 sps:$4 sm:$0xff]  }
   0x3   :  { %237 = vmatpush1.bf16.msra.mxu0 %v1568_v2  ;;  %1561 = vmatpush1.bf16.msra.mxu1 %v1568_v2  ;;  %v1575_v7 = vld [vmem:[%s2413_s2 + $0x4] ss:$8 sps:$4 sm:$0xff]   ;;  %v1577_v8 = vld [vmem:[%s2413_s2] ss:$8 sps:$4 sm:$0xff]   ;;  %v1582_v13 = vld [vmem:[%s2414_s1 + $0x10] sm:$0xff]   ;;  %s645_s11 = ssub.f32 0.0, %s2415_s0 }
   0x4   :  { %238 = vmatprep.subr.bf16.mxu0 %v1569_v3  ;;  %1558 = vmatprep.subr.bf16.mxu1 %v1569_v3  ;;  %v1578_v9 = vld [vmem:[%s2414_s1] sm:$0xff]   ;;  %v1580_v11 = vld [vmem:[%s2414_s1 + $0x8] sm:$0xff]   ;;  %v1583_v14 = vld [vmem:[%s2414_s1 + $0x50] sm:$0xff]  }
   0x5   :  { %v1579_v10 = vld [vmem:[%s2414_s1 + $0x40] sm:$0xff]   ;;  %v1581_v12 = vld [vmem:[%s2414_s1 + $0x48] sm:$0xff]   ;;  %v1584_v15 = vld [vmem:[%s2414_s1 + $0x18] sm:$0xff]   ;;  %v1863_v30 = vstv %s645_s11 }
   0x6   :  { %v1585_v16 = vld [vmem:[%s2414_s1 + $0x58] sm:$0xff]   ;;  %v1586_v17 = vld [vmem:[%s2414_s1 + $0x20] sm:$0xff]   ;;  %v1588_v19 = vld [vmem:[%s2414_s1 + $0x28] sm:$0xff]  }
   0x7   :  { %239 = vmatpush1.bf16.msra.mxu0 %v1571_v4  ;;  %1562 = vmatpush1.bf16.msra.mxu1 %v1571_v4  ;;  %v1587_v18 = vld [vmem:[%s2414_s1 + $0x60] sm:$0xff]   ;;  %v1589_v20 = vld [vmem:[%s2414_s1 + $0x68] sm:$0xff]   ;;  %v1590_v21 = vld [vmem:[%s2414_s1 + $0x30] sm:$0xff]  }
   0x8   :  { %240 = vmatprep.subr.bf16.mxu0 %v1572_v5  ;;  %1559 = vmatprep.subr.bf16.mxu1 %v1572_v5  ;;  %v1591_v22 = vld [vmem:[%s2414_s1 + $0x70] sm:$0xff]   ;;  %v1592_v23 = vld [vmem:[%s2414_s1 + $0x38] sm:$0xff]  }
   0x9   :  { %v1593_v24 = vld [vmem:[%s2414_s1 + $0x78] sm:$0xff]  }
   0xb   :  { %241 = vmatpush1.bf16.msra.mxu0 %v1574_v6  ;;  %1563 = vmatpush1.bf16.msra.mxu1 %v1574_v6 }
   0xc   :  { %242 = vmatprep.subr.bf16.mxu0 %v1575_v7  ;;  %1560 = vmatprep.subr.bf16.mxu1 %v1575_v7 }
   0xf   :  { %243 = vmatpush1.bf16.msra.mxu0 %v1577_v8  ;;  %1564 = vmatpush1.bf16.msra.mxu1 %v1577_v8 }
  0x12   :  { %1191 = vmatmul.mubr.msk.bf16.vlgmr.msra.gmra.mxu0 %vm179_vm0, %v1578_v9  ;;  %1199 = vmatmul.mubr.msk.bf16.vlgmr.msra.gmra.mxu1 %vm179_vm0, %v1579_v10 }
  0x13   :  { %270 = vmatprep.mubr.bf16.mxu0 %v1722_v1  ;;  %350 = vmatprep.mubr.bf16.mxu1 %v1722_v1 }
  0x1a   :  { %1192 = vmatmul.mubr.msk.bf16.gmra.mxu0 %vm179_vm0, %v1580_v11  ;;  %1200 = vmatmul.mubr.msk.bf16.gmra.mxu1 %vm179_vm0, %v1581_v12 }
  0x1b   :  { %280 = vmatprep.mubr.bf16.mxu0 %v1722_v1  ;;  %360 = vmatprep.mubr.bf16.mxu1 %v1722_v1 }
  0x22   :  { %1193 = vmatmul.mubr.msk.bf16.gmra.mxu0 %vm179_vm0, %v1582_v13  ;;  %1201 = vmatmul.mubr.msk.bf16.gmra.mxu1 %vm179_vm0, %v1583_v14 }
  0x23   :  { %290 = vmatprep.mubr.bf16.mxu0 %v1722_v1  ;;  %370 = vmatprep.mubr.bf16.mxu1 %v1722_v1 }
  0x2a   :  { %1194 = vmatmul.mubr.msk.bf16.gmra.mxu0 %vm179_vm0, %v1584_v15  ;;  %1202 = vmatmul.mubr.msk.bf16.gmra.mxu1 %vm179_vm0, %v1585_v16 }
  0x2b   :  { %300 = vmatprep.mubr.bf16.mxu0 %v1722_v1  ;;  %380 = vmatprep.mubr.bf16.mxu1 %v1722_v1 }
  0x32   :  { %1195 = vmatmul.mubr.msk.bf16.gmra.mxu0 %vm179_vm0, %v1586_v17  ;;  %1203 = vmatmul.mubr.msk.bf16.gmra.mxu1 %vm179_vm0, %v1587_v18 }
  0x33   :  { %310 = vmatprep.mubr.bf16.mxu0 %v1722_v1  ;;  %390 = vmatprep.mubr.bf16.mxu1 %v1722_v1 }
  0x3a   :  { %1196 = vmatmul.mubr.msk.bf16.gmra.mxu0 %vm179_vm0, %v1588_v19  ;;  %1204 = vmatmul.mubr.msk.bf16.gmra.mxu1 %vm179_vm0, %v1589_v20 }
  0x3b   :  { %320 = vmatprep.mubr.bf16.mxu0 %v1722_v1  ;;  %400 = vmatprep.mubr.bf16.mxu1 %v1722_v1 }
  0x42   :  { %1197 = vmatmul.mubr.msk.bf16.gmra.mxu0 %vm179_vm0, %v1590_v21  ;;  %1205 = vmatmul.mubr.msk.bf16.gmra.mxu1 %vm179_vm0, %v1591_v22 }
  0x43   :  { %330 = vmatprep.mubr.bf16.mxu0 %v1722_v1  ;;  %410 = vmatprep.mubr.bf16.mxu1 %v1722_v1 }
  0x4a   :  { %1198 = vmatmul.mubr.msk.bf16.gmra.mxu0 %vm179_vm0, %v1592_v23  ;;  %1206 = vmatmul.mubr.msk.bf16.gmra.mxu1 %vm179_vm0, %v1593_v24 }
  0xd2   :  { %v1855_v25 = vpop.f32.mrf.mxu0  ;;  %v1857_v26 = vpop.f32.mrf.mxu1 }
  0xd3   :  { %v485_v27 = vmin.f32 %v1855_v25, 0.0  ;;  %v501_v28 = vmin.f32 %v1857_v26, 0.0  ;;  %vm453_vm1 = vcmp.gt.f32.partialorder %v1855_v25, 0.0  ;;  %vm469_vm2 = vcmp.gt.f32.partialorder %v1857_v26, 0.0 }
  0xd4   :  { %v1861_v29 = vpop.f32.mrf.mxu0  ;;  %v1865_v31 = vpop.f32.mrf.mxu1 }
  0xd5   :  { %v517_v32 = vmul.f32 1.442695, %v485_v27  ;;  %v549_v33 = vmul.f32 1.442695, %v501_v28  ;;  %v421_v34 = vmax.f32 %v1861_v29, 0.0  ;;  %v437_v35 = vmax.f32 %v1865_v31, 0.0 }
  0xd6   :  { %v1869_v36 = vpop.f32.mrf.mxu0  ;;  %v1871_v37 = vpop.f32.mrf.mxu1 }
  0xd7   :  { %1594 = vpow2.f32 %v517_v32  ;;  %v647_v38 = vmul.f32 %v1863_v30, %v421_v34  ;;  %v663_v39 = vmul.f32 %v1863_v30, %v437_v35  ;;  %v486_v40 = vmin.f32 %v1869_v36, 0.0 }
  0xd8   :  { %1596 = vpow2.f32 %v549_v33  ;;  %v502_v41 = vmin.f32 %v1871_v37, 0.0  ;;  %v1881_v42 = vpop.f32.mrf.mxu0  ;;  %v1883_v43 = vpop.f32.mrf.mxu1  ;;  %vm454_vm3 = vcmp.gt.f32.partialorder %v1869_v36, 0.0  ;;  %vm470_vm4 = vcmp.gt.f32.partialorder %v1871_v37, 0.0 }
  0xd9   :  { %v679_v44 = vmul.f32 1.442695, %v647_v38  ;;  %v711_v45 = vmul.f32 1.442695, %v663_v39  ;;  %v422_v46 = vmax.f32 %v1881_v42, 0.0  ;;  %v438_v47 = vmax.f32 %v1883_v43, 0.0 }
  0xda   :  { %v519_v48 = vmul.f32 1.442695, %v486_v40  ;;  %v551_v49 = vmul.f32 1.442695, %v502_v41  ;;  %v1887_v50 = vpop.f32.mrf.mxu0  ;;  %v1889_v51 = vpop.f32.mrf.mxu1 }
  0xdb   :  { %1598 = vpow2.f32 %v679_v44  ;;  %v648_v52 = vmul.f32 %v1863_v30, %v422_v46  ;;  %v664_v53 = vmul.f32 %v1863_v30, %v438_v47  ;;  %v487_v54 = vmin.f32 %v1887_v50, 0.0 }
  0xdc   :  { %1600 = vpow2.f32 %v711_v45  ;;  %v503_v55 = vmin.f32 %v1889_v51, 0.0  ;;  %v1899_v56 = vpop.f32.mrf.mxu0  ;;  %v1901_v57 = vpop.f32.mrf.mxu1  ;;  %vm455_vm5 = vcmp.gt.f32.partialorder %v1887_v50, 0.0  ;;  %vm471_vm6 = vcmp.gt.f32.partialorder %v1889_v51, 0.0 }
  0xdd   :  { %1602 = vpow2.f32 %v519_v48  ;;  %v681_v58 = vmul.f32 1.442695, %v648_v52  ;;  %v713_v59 = vmul.f32 1.442695, %v664_v53  ;;  %v423_v60 = vmax.f32 %v1899_v56, 0.0 }
  0xde   :  { %1604 = vpow2.f32 %v551_v49  ;;  %v521_v61 = vmul.f32 1.442695, %v487_v54  ;;  %v553_v62 = vmul.f32 1.442695, %v503_v55  ;;  %v439_v63 = vmax.f32 %v1901_v57, 0.0  ;;  %v1905_v0 = vpop.f32.mrf.mxu0  ;;  %v1907_v1 = vpop.f32.mrf.mxu1 }
  0xdf   :  { %1606 = vpow2.f32 %v681_v58  ;;  %v649_v2 = vmul.f32 %v1863_v30, %v423_v60  ;;  %v488_v3 = vmin.f32 %v1905_v0, 0.0  ;;  %v504_v5 = vmin.f32 %v1907_v1, 0.0 }
  0xe0   :  { %1608 = vpow2.f32 %v713_v59  ;;  %v665_v4 = vmul.f32 %v1863_v30, %v439_v63  ;;  %v1918_v6 = vpop.f32.mrf.mxu0  ;;  %v1920_v7 = vpop.f32.mrf.mxu1  ;;  %vm456_vm7 = vcmp.gt.f32.partialorder %v1905_v0, 0.0  ;;  %vm472_vm8 = vcmp.gt.f32.partialorder %v1907_v1, 0.0 }
  0xe1   :  { %1610 = vpow2.f32 %v521_v61  ;;  %v683_v8 = vmul.f32 1.442695, %v649_v2  ;;  %v523_v9 = vmul.f32 1.442695, %v488_v3  ;;  %v424_v10 = vmax.f32 %v1918_v6, 0.0 }
  0xe2   :  { %1612 = vpow2.f32 %v553_v62  ;;  %v715_v11 = vmul.f32 1.442695, %v665_v4  ;;  %v555_v12 = vmul.f32 1.442695, %v504_v5  ;;  %v440_v13 = vmax.f32 %v1920_v7, 0.0  ;;  %v1924_v14 = vpop.f32.mrf.mxu0  ;;  %v1926_v15 = vpop.f32.mrf.mxu1 }
  0xe3   :  { %1614 = vpow2.f32 %v683_v8  ;;  %v650_v16 = vmul.f32 %v1863_v30, %v424_v10  ;;  %v489_v17 = vmin.f32 %v1924_v14, 0.0  ;;  %v505_v20 = vmin.f32 %v1926_v15, 0.0 }
  0xe4   :  { %v1595_v18 = vpop.eup %1594  ;;  %1616 = vpow2.f32 %v715_v11  ;;  %v666_v19 = vmul.f32 %v1863_v30, %v440_v13  ;;  %v1938_v21 = vpop.f32.mrf.mxu0  ;;  %vm457_vm9 = vcmp.gt.f32.partialorder %v1924_v14, 0.0  ;;  %vm473_vm10 = vcmp.gt.f32.partialorder %v1926_v15, 0.0 }
  0xe5   :  { %v1940_v22 = vpop.f32.mrf.mxu1  ;;  %v1597_v23 = vpop.eup %1596  ;;  %v1207_v24 = vadd.f32 -1.0, %v1595_v18  ;;  %1618 = vpow2.f32 %v523_v9  ;;  %v685_v27 = vmul.f32 1.442695, %v650_v16  ;;  %v525_v28 = vmul.f32 1.442695, %v489_v17 }
  0xe6   :  { %v1223_v32 = vadd.f32 -1.0, %v1597_v23  ;;  %1620 = vpow2.f32 %v555_v12  ;;  %v717_v33 = vmul.f32 1.442695, %v666_v19  ;;  %v557_v38 = vmul.f32 1.442695, %v505_v20  ;;  %v1943_v39 = vpop.f32.mrf.mxu0 }
  0xe7   :  { %v1945_v40 = vpop.f32.mrf.mxu1  ;;  %v613_v41 = vsel %vm453_vm1, %v1855_v25, %v1207_v24  ;;  %1622 = vpow2.f32 %v685_v27  ;;  %v425_v44 = vmax.f32 %v1938_v21, 0.0  ;;  %v441_v45 = vmax.f32 %v1940_v22, 0.0 }
  0xe8   :  { %v1599_v48 = vpop.eup %1598  ;;  %v629_v49 = vsel %vm469_vm2, %v1857_v26, %v1223_v32  ;;  %1624 = vpow2.f32 %v717_v33  ;;  %v490_v52 = vmin.f32 %v1943_v39, 0.0  ;;  %v1957_v53 = vpop.f32.mrf.mxu0  ;;  %v506_v20 = vmin.f32 %v1945_v40, 0.0 }
  0xe9   :  { %v1959_v54 = vpop.f32.mrf.mxu1  ;;  %v1601_v25 = vpop.eup %1600  ;;  %v935_v55 = vmul.f32 %v1599_v48, %v421_v34  ;;  %1626 = vpow2.f32 %v525_v28  ;;  %v651_v26 = vmul.f32 %v1863_v30, %v425_v44  ;;  %v743_v59 = vmul.f32 %v1599_v48, %v613_v41 }
  0xea   :  { %v1603_v58 = vpop.eup %1602  ;;  %v951_v61 = vmul.f32 %v1601_v25, %v437_v35  ;;  %1628 = vpow2.f32 %v557_v38  ;;  %v667_v62 = vmul.f32 %v1863_v30, %v441_v45  ;;  %v1972_v2 = vpop.f32.mrf.mxu0  ;;  %v759_v3 = vmul.f32 %v1601_v25, %v629_v49 }
  0xeb   :  { %v1974_v29 = vpop.f32.mrf.mxu1  ;;  %v1605_v34 = vpop.eup %1604  ;;  %v1208_v4 = vadd.f32 -1.0, %v1603_v58  ;;  %v687_v5 = vmul.f32 1.442695, %v651_v26  ;;  %v527_v8 = vmul.f32 1.442695, %v490_v52  ;;  %v967_v11 = vmul.f32 %v1599_v48, %v935_v55 }
  0xec   :  { %v1607_v9 = vpop.eup %1606  ;;  %v983_v12 = vmul.f32 %v1601_v25, %v951_v61  ;;  %v1224_v16 = vadd.f32 -1.0, %v1605_v34  ;;  %v719_v31 = vmul.f32 1.442695, %v667_v62  ;;  %v1977_v35 = vpop.f32.mrf.mxu0  ;;  %v559_v52 = vmul.f32 1.442695, %v506_v20 }
  0xed   :  { %v1609_v17 = vpop.eup %1608  ;;  %v614_v18 = vsel %vm454_vm3, %v1869_v36, %v1208_v4  ;;  %v936_v19 = vmul.f32 %v1607_v9, %v422_v46  ;;  %1630 = vpow2.f32 %v687_v5  ;;  %v1985_v23 = vpop.f32.mrf.mxu1  ;;  %v442_v5 = vmax.f32 %v1959_v54, 0.0 }
  0xee   :  { %v1611_v24 = vpop.eup %1610  ;;  %v630_v27 = vsel %vm470_vm4, %v1871_v37, %v1224_v16  ;;  %v744_v28 = vmul.f32 %v1607_v9, %v614_v18  ;;  %v952_v32 = vmul.f32 %v1609_v17, %v438_v47  ;;  %1632 = vpow2.f32 %v719_v31  ;;  %v1992_v25 = vpop.f32.mrf.mxu0 }
  0xef   :  { %v1613_v33 = vpop.eup %1612  ;;  %v968_v36 = vmul.f32 %v1607_v9, %v936_v19  ;;  %v760_v38 = vmul.f32 %v1609_v17, %v630_v27  ;;  %v1209_v42 = vadd.f32 -1.0, %v1611_v24  ;;  %1634 = vpow2.f32 %v527_v8  ;;  %v1999_v58 = vpop.f32.mrf.mxu1 }
  0xf0   :  { %v1615_v46 = vpop.eup %1614  ;;  %v1370_v41 = vpack.c.bf16 %v744_v28, %v743_v59  ;;  %v984_v48 = vmul.f32 %v1609_v17, %v952_v32  ;;  %v1225_v49 = vadd.f32 -1.0, %v1613_v33  ;;  %1636 = vpow2.f32 %v559_v52  ;;  %v2021_v8 = vpop.f32.mrf.mxu0 }
  0xf1   :  { %v1617_v55 = vpop.eup %1616  ;;  %v1450_v26 = vpack.c.bf16 %v968_v36, %v967_v11  ;;  %v1410_v37 = vpack.c.bf16 %v760_v38, %v759_v3  ;;  %v615_v43 = vsel %vm455_vm5, %v1887_v50, %v1209_v42  ;;  %v937_v47 = vmul.f32 %v1615_v46, %v423_v60  ;;  %v2029_v17 = vpop.f32.mrf.mxu1 }
  0xf2   :  { %v1619_v61 = vpop.eup %1618  ;;  %1371 = vst [vmem:[%s2416_s3] sm:$0xff] %v1370_v41   ;;  %v1490_v59 = vpack.c.bf16 %v984_v48, %v983_v12  ;;  %v631_v62 = vsel %vm471_vm6, %v1889_v51, %v1225_v49  ;;  %v953_v34 = vmul.f32 %v1617_v55, %v439_v63  ;;  %v745_v56 = vmul.f32 %v1615_v46, %v615_v43  ;;  %v2042_v42 = vpop.f32.mrf.mxu0 }
  0xf3   :  { %v1621_v50 = vpop.eup %1620  ;;  %1451 = vst [vmem:[%s2417_s4] sm:$0xff] %v1450_v26   ;;  %1534 = vst [vmem:[%s2416_s3 + $0x40] sm:$0xff] %v1410_v37   ;;  %v969_v60 = vmul.f32 %v1615_v46, %v937_v47  ;;  %v1210_v3 = vadd.f32 -1.0, %v1619_v61  ;;  %v761_v51 = vmul.f32 %v1617_v55, %v631_v62  ;;  %v426_v63 = vmax.f32 %v1957_v53, 0.0  ;;  %v2044_v41 = vpop.f32.mrf.mxu1 }
  0xf4   :  { %v1623_v4 = vpop.eup %1622  ;;  %1549 = vst [vmem:[%s2417_s4 + $0x40] sm:$0xff] %v1490_v59   ;;  %v1226_v57 = vadd.f32 -1.0, %v1621_v50  ;;  %v985_v11 = vmul.f32 %v1617_v55, %v953_v34  ;;  %v491_v31 = vmin.f32 %v1972_v2, 0.0  ;;  %v668_v32 = vmul.f32 %v1863_v30, %v442_v5  ;;  %v2063_v61 = vpop.f32.mrf.mxu0 }
  0xf5   :  { %v1625_v9 = vpop.eup %1624  ;;  %v616_v12 = vsel %vm456_vm7, %v1905_v0, %v1210_v3  ;;  %v938_v16 = vmul.f32 %v1623_v4, %v424_v10  ;;  %v652_v0 = vmul.f32 %v1863_v30, %v426_v63  ;;  %v507_v47 = vmin.f32 %v1974_v29, 0.0  ;;  %v2069_v62 = vpop.f32.mrf.mxu1 }
  0xf6   :  { %v1627_v18 = vpop.eup %1626  ;;  %v632_v19 = vsel %vm472_vm8, %v1907_v1, %v1226_v57  ;;  %v746_v20 = vmul.f32 %v1623_v4, %v616_v12  ;;  %v954_v24 = vmul.f32 %v1625_v9, %v440_v13  ;;  %v721_v46 = vmul.f32 1.442695, %v668_v32 }
  0xf7   :  { %v1629_v27 = vpop.eup %1628  ;;  %v970_v6 = vmul.f32 %v1623_v4, %v938_v16  ;;  %v762_v10 = vmul.f32 %v1625_v9, %v632_v19  ;;  %v1211_v28 = vadd.f32 -1.0, %v1627_v18  ;;  %v689_v1 = vmul.f32 1.442695, %v652_v0  ;;  %v2091_v19 = vpop.f32.mrf.mxu1 }
  0xf8   :  { %v1375_v33 = vpack.c.bf16 %v746_v20, %v745_v56  ;;  %v986_v36 = vmul.f32 %v1625_v9, %v954_v24  ;;  %v1227_v38 = vadd.f32 -1.0, %v1629_v27  ;;  %v529_v52 = vmul.f32 1.442695, %v491_v31 }
  0xf9   :  { %v1455_v7 = vpack.c.bf16 %v970_v6, %v969_v60  ;;  %v1415_v13 = vpack.c.bf16 %v762_v10, %v761_v51  ;;  %1638 = vpow2.f32 %v689_v1  ;;  %v617_v26 = vsel %vm457_vm9, %v1924_v14, %v1211_v28  ;;  %v2108_v1 = vpop.f32.mrf.mxu1 }
  0xfa   :  { %v1631_v48 = vpop.eup %1630  ;;  %1527 = vst [vmem:[%s2416_s3 + $0x8] sm:$0xff] %v1375_v33   ;;  %v1495_v49 = vpack.c.bf16 %v986_v36, %v985_v11  ;;  %1640 = vpow2.f32 %v721_v46  ;;  %v633_v43 = vsel %vm473_vm10, %v1926_v15, %v1227_v38  ;;  %vm458_vm11 = vcmp.gt.f32.partialorder %v1943_v39, 0.0  ;;  %v2086_v11 = vpop.f32.mrf.mxu0 }
  0xfb   :  { %v1633_v55 = vpop.eup %1632  ;;  %1542 = vst [vmem:[%s2417_s4 + $0x8] sm:$0xff] %v1455_v7   ;;  %1535 = vst [vmem:[%s2416_s3 + $0x48] sm:$0xff] %v1415_v13   ;;  %1642 = vpow2.f32 %v529_v52  ;;  %vm474_vm12 = vcmp.gt.f32.partialorder %v1945_v40, 0.0  ;;  %v427_v14 = vmax.f32 %v1977_v35, 0.0  ;;  %v443_v59 = vmax.f32 %v1985_v23, 0.0 }
  0xfc   :  { %v1635_v37 = vpop.eup %1634  ;;  %1550 = vst [vmem:[%s2417_s4 + $0x48] sm:$0xff] %v1495_v49   ;;  %v2071_v34 = vmul.f32 %v1631_v48, %v617_v26  ;;  %v939_v15 = vmul.f32 %v1631_v48, %v425_v44  ;;  %v561_v50 = vmul.f32 1.442695, %v507_v47  ;;  %v492_v56 = vmin.f32 %v1992_v25, 0.0  ;;  %v2104_v32 = vpop.f32.mrf.mxu0 }
  0xfd   :  { %v2076_v60 = vmul.f32 %v1633_v55, %v633_v43  ;;  %v1212_v3 = vadd.f32 -1.0, %v1635_v37  ;;  %v653_v4 = vmul.f32 %v1863_v30, %v427_v14  ;;  %v669_v51 = vmul.f32 %v1863_v30, %v443_v59  ;;  %v1637_v57 = vpop.eup %1636 }
  0xfe   :  { %1644 = vpow2.f32 %v561_v50  ;;  %v531_v9 = vmul.f32 1.442695, %v492_v56  ;;  %v508_v21 = vmin.f32 %v1999_v58, 0.0  ;;  %v428_v44 = vmax.f32 %v2021_v8, 0.0 }
  0xff   :  { %v955_v12 = vmul.f32 %v1633_v55, %v441_v45  ;;  %v691_v16 = vmul.f32 1.442695, %v653_v4  ;;  %v723_v31 = vmul.f32 1.442695, %v669_v51  ;;  %v444_v18 = vmax.f32 %v2029_v17, 0.0 }
 0x100   :  { %v1228_v20 = vadd.f32 -1.0, %v1637_v57  ;;  %1646 = vpow2.f32 %v531_v9  ;;  %v563_v24 = vmul.f32 1.442695, %v508_v21  ;;  %v654_v0 = vmul.f32 %v1863_v30, %v428_v44 }
 0x101   :  { %v971_v27 = vmul.f32 %v1631_v48, %v939_v15  ;;  %1648 = vpow2.f32 %v691_v16  ;;  %v670_v22 = vmul.f32 %v1863_v30, %v444_v18  ;;  %v493_v45 = vmin.f32 %v2042_v42, 0.0 }
 0x102   :  { %v618_v6 = vsel %vm458_vm11, %v1943_v39, %v1212_v3  ;;  %1650 = vpow2.f32 %v723_v31  ;;  %v693_v10 = vmul.f32 1.442695, %v654_v0  ;;  %v509_v28 = vmin.f32 %v2044_v41, 0.0  ;;  %v2128_v3 = vpop.f32.mrf.mxu1 }
 0x103   :  { %vm459_vm13 = vcmp.gt.f32.partialorder %v1972_v2, 0.0  ;;  %1652 = vpow2.f32 %v563_v24  ;;  %v725_v33 = vmul.f32 1.442695, %v670_v22  ;;  %v533_v36 = vmul.f32 1.442695, %v493_v45 }
 0x104   :  { %v429_v38 = vmax.f32 %v2063_v61, 0.0  ;;  %v634_v7 = vsel %vm474_vm12, %v1945_v40, %v1228_v20  ;;  %1654 = vpow2.f32 %v693_v10  ;;  %v565_v39 = vmul.f32 1.442695, %v509_v28  ;;  %v2144_v20 = vpop.f32.mrf.mxu1 }
 0x105   :  { %v445_v13 = vmax.f32 %v2069_v62, 0.0  ;;  %v987_v48 = vmul.f32 %v1633_v55, %v955_v12  ;;  %vm475_vm14 = vcmp.gt.f32.partialorder %v1974_v29, 0.0  ;;  %1656 = vpow2.f32 %v725_v33  ;;  %v2124_v55 = vpop.f32.mrf.mxu0 }
 0x106   :  { %v1639_v46 = vpop.eup %1638  ;;  %v655_v49 = vmul.f32 %v1863_v30, %v429_v38  ;;  %v494_v52 = vmin.f32 %v2086_v11, 0.0  ;;  %1658 = vpow2.f32 %v533_v36  ;;  %vm460_vm15 = vcmp.gt.f32.partialorder %v1992_v25, 0.0 }
 0x107   :  { %v1641_v26 = vpop.eup %1640  ;;  %v748_v37 = vmul.f32 %v1639_v46, %v618_v6  ;;  %v940_v40 = vmul.f32 %v1639_v46, %v426_v63  ;;  %v671_v43 = vmul.f32 %v1863_v30, %v445_v13  ;;  %1660 = vpow2.f32 %v565_v39  ;;  %v2137_v12 = vpop.f32.mrf.mxu0 }
 0x108   :  { %v1643_v47 = vpop.eup %1642  ;;  %v764_v15 = vmul.f32 %v1641_v26, %v634_v7  ;;  %v956_v50 = vmul.f32 %v1641_v26, %v442_v5  ;;  %v695_v56 = vmul.f32 1.442695, %v655_v49  ;;  %v535_v21 = vmul.f32 1.442695, %v494_v52 }
 0x109   :  { %v1380_v4 = vpack.c.bf16 %v748_v37, %v2071_v34  ;;  %v972_v53 = vmul.f32 %v1639_v46, %v940_v40  ;;  %v1213_v63 = vadd.f32 -1.0, %v1643_v47  ;;  %v727_v51 = vmul.f32 1.442695, %v671_v43  ;;  %v2167_v39 = vpop.f32.mrf.mxu0  ;;  %v2171_v37 = vpop.f32.mrf.mxu1 }
 0x10a   :  { %v1420_v57 = vpack.c.bf16 %v764_v15, %v2076_v60  ;;  %v988_v9 = vmul.f32 %v1641_v26, %v956_v50  ;;  %1662 = vpow2.f32 %v695_v56  ;;  %v510_v5 = vmin.f32 %v2091_v19, 0.0 }
 0x10b   :  { %1528 = vst [vmem:[%s2416_s3 + $0x10] sm:$0xff] %v1380_v4   ;;  %v1460_v54 = vpack.c.bf16 %v972_v53, %v971_v27  ;;  %1664 = vpow2.f32 %v727_v51  ;;  %v1645_v34 = vpop.eup %1644  ;;  %v430_v16 = vmax.f32 %v2104_v32, 0.0  ;;  %v446_v31 = vmax.f32 %v2108_v1, 0.0  ;;  %v2180_v51 = vpop.f32.mrf.mxu0 }
 0x10c   :  { %1536 = vst [vmem:[%s2416_s3 + $0x50] sm:$0xff] %v1420_v57   ;;  %v1500_v60 = vpack.c.bf16 %v988_v9, %v987_v48  ;;  %1666 = vpow2.f32 %v535_v21  ;;  %v619_v24 = vsel %vm459_vm13, %v1972_v2, %v1213_v63  ;;  %v1229_v0 = vadd.f32 -1.0, %v1645_v34  ;;  %v2188_v9 = vpop.f32.mrf.mxu1 }
 0x10d   :  { %1543 = vst [vmem:[%s2417_s4 + $0x10] sm:$0xff] %v1460_v54   ;;  %v567_v27 = vmul.f32 1.442695, %v510_v5  ;;  %v495_v22 = vmin.f32 %v2124_v55, 0.0  ;;  %v1647_v45 = vpop.eup %1646  ;;  %vm476_vm0 = vcmp.gt.f32.partialorder %v1999_v58, 0.0  ;;  %v656_v6 = vmul.f32 %v1863_v30, %v430_v16 }
 0x10e   :  { %1551 = vst [vmem:[%s2417_s4 + $0x50] sm:$0xff] %v1500_v60   ;;  %v672_v10 = vmul.f32 %v1863_v30, %v446_v31  ;;  %v511_v2 = vmin.f32 %v2128_v3, 0.0  ;;  %v1649_v28 = vpop.eup %1648  ;;  %v635_v33 = vsel %vm475_vm14, %v1974_v29, %v1229_v0  ;;  %v1214_v36 = vadd.f32 -1.0, %v1647_v45 }
 0x10f   :  { %1668 = vpow2.f32 %v567_v27  ;;  %v537_v7 = vmul.f32 1.442695, %v495_v22  ;;  %v1651_v46 = vpop.eup %1650  ;;  %v749_v48 = vmul.f32 %v1649_v28, %v619_v24  ;;  %v941_v49 = vmul.f32 %v1649_v28, %v427_v14  ;;  %v2197_v27 = vpop.f32.mrf.mxu0 }
 0x110   :  { %v697_v52 = vmul.f32 1.442695, %v656_v6  ;;  %v729_v26 = vmul.f32 1.442695, %v672_v10  ;;  %v1653_v40 = vpop.eup %1652  ;;  %v765_v43 = vmul.f32 %v1651_v46, %v635_v33  ;;  %v957_v47 = vmul.f32 %v1651_v46, %v443_v59  ;;  %v2201_v6 = vpop.f32.mrf.mxu1 }
 0x111   :  { %v620_v29 = vsel %vm460_vm15, %v1992_v25, %v1214_v36  ;;  %1670 = vpow2.f32 %v537_v7  ;;  %v1655_v15 = vpop.eup %1654  ;;  %v973_v50 = vmul.f32 %v1649_v28, %v941_v49  ;;  %v1230_v56 = vadd.f32 -1.0, %v1653_v40 }
 0x112   :  { %1672 = vpow2.f32 %v697_v52  ;;  %v569_v35 = vmul.f32 1.442695, %v511_v2  ;;  %v1657_v14 = vpop.eup %1656  ;;  %v989_v4 = vmul.f32 %v1651_v46, %v957_v47  ;;  %v750_v53 = vmul.f32 %v1655_v15, %v620_v29  ;;  %v2229_v29 = vpop.f32.mrf.mxu1 }
 0x113   :  { %v942_v63 = vmul.f32 %v1655_v15, %v428_v44  ;;  %1674 = vpow2.f32 %v729_v26  ;;  %v1659_v23 = vpop.eup %1658  ;;  %v636_v25 = vsel %vm476_vm0, %v1999_v58, %v1230_v56  ;;  %v958_v59 = vmul.f32 %v1657_v14, %v444_v18  ;;  %v2223_v26 = vpop.f32.mrf.mxu0 }
 0x114   :  { %1676 = vpow2.f32 %v569_v35  ;;  %v431_v57 = vmax.f32 %v2137_v12, 0.0  ;;  %v1661_v21 = vpop.eup %1660  ;;  %v1385_v54 = vpack.c.bf16 %v750_v53, %v749_v48  ;;  %v766_v44 = vmul.f32 %v1657_v14, %v636_v25 }
 0x115   :  { %v974_v8 = vmul.f32 %v1655_v15, %v942_v63  ;;  %v1215_v5 = vadd.f32 -1.0, %v1659_v23  ;;  %v990_v34 = vmul.f32 %v1657_v14, %v958_v59  ;;  %v1231_v60 = vadd.f32 -1.0, %v1661_v21  ;;  %v2244_v53 = vpop.f32.mrf.mxu0 }
 0x116   :  { %v657_v24 = vmul.f32 %v1863_v30, %v431_v57  ;;  %v447_v58 = vmax.f32 %v2144_v20, 0.0  ;;  %1529 = vst [vmem:[%s2416_s3 + $0x18] sm:$0xff] %v1385_v54   ;;  %v1425_v0 = vpack.c.bf16 %v766_v44, %v765_v43  ;;  %vm461_vm1 = vcmp.gt.f32.partialorder %v2042_v42, 0.0  ;;  %v2248_v54 = vpop.f32.mrf.mxu1 }
 0x117   :  { %v1663_v17 = vpop.eup %1662  ;;  %v1465_v18 = vpack.c.bf16 %v974_v8, %v973_v50  ;;  %v1505_v45 = vpack.c.bf16 %v990_v34, %v989_v4  ;;  %vm477_vm2 = vcmp.gt.f32.partialorder %v2044_v41, 0.0  ;;  %vm462_vm3 = vcmp.gt.f32.partialorder %v2086_v11, 0.0 }
 0x118   :  { %v1665_v22 = vpop.eup %1664  ;;  %1537 = vst [vmem:[%s2416_s3 + $0x58] sm:$0xff] %v1425_v0   ;;  %vm478_vm4 = vcmp.gt.f32.partialorder %v2091_v19, 0.0  ;;  %v699_v2 = vmul.f32 1.442695, %v657_v24  ;;  %v673_v28 = vmul.f32 %v1863_v30, %v447_v58  ;;  %v621_v33 = vsel %vm461_vm1, %v2042_v42, %v1215_v5 }
 0x119   :  { %v1667_v10 = vpop.eup %1666  ;;  %1544 = vst [vmem:[%s2417_s4 + $0x18] sm:$0xff] %v1465_v18   ;;  %1552 = vst [vmem:[%s2417_s4 + $0x58] sm:$0xff] %v1505_v45   ;;  %v637_v36 = vsel %vm477_vm2, %v2044_v41, %v1231_v60  ;;  %v496_v46 = vmin.f32 %v2167_v39, 0.0  ;;  %v943_v48 = vmul.f32 %v1663_v17, %v429_v38  ;;  %v512_v52 = vmin.f32 %v2171_v37, 0.0 }
 0x11a   :  { %v1216_v7 = vadd.f32 -1.0, %v1667_v10  ;;  %1678 = vpow2.f32 %v699_v2  ;;  %v731_v49 = vmul.f32 1.442695, %v673_v28  ;;  %v959_v43 = vmul.f32 %v1665_v22, %v445_v13 }
 0x11b   :  { %v539_v47 = vmul.f32 1.442695, %v496_v46  ;;  %v432_v42 = vmax.f32 %v2180_v51, 0.0  ;;  %v448_v41 = vmax.f32 %v2188_v9, 0.0  ;;  %v571_v15 = vmul.f32 1.442695, %v512_v52 }
 0x11c   :  { %v1669_v40 = vpop.eup %1668  ;;  %v622_v61 = vsel %vm462_vm3, %v2086_v11, %v1216_v7  ;;  %1680 = vpow2.f32 %v731_v49  ;;  %v497_v56 = vmin.f32 %v2197_v27, 0.0  ;;  %v751_v14 = vmul.f32 %v1663_v17, %v621_v33 }
 0x11d   :  { %v1232_v38 = vadd.f32 -1.0, %v1669_v40  ;;  %1682 = vpow2.f32 %v539_v47  ;;  %v658_v62 = vmul.f32 %v1863_v30, %v432_v42  ;;  %v674_v13 = vmul.f32 %v1863_v30, %v448_v41 }
 0x11e   :  { %v1671_v50 = vpop.eup %1670  ;;  %v767_v4 = vmul.f32 %v1665_v22, %v637_v36  ;;  %1684 = vpow2.f32 %v571_v15  ;;  %v975_v44 = vmul.f32 %v1663_v17, %v943_v48  ;;  %v541_v60 = vmul.f32 1.442695, %v497_v56 }
 0x11f   :  { %v1673_v35 = vpop.eup %1672  ;;  %v638_v11 = vsel %vm478_vm4, %v2091_v19, %v1232_v38  ;;  %v701_v59 = vmul.f32 1.442695, %v658_v62  ;;  %v733_v21 = vmul.f32 1.442695, %v674_v13  ;;  %v991_v19 = vmul.f32 %v1665_v22, %v959_v43 }
 0x120   :  { %v1675_v63 = vpop.eup %1674  ;;  %v752_v23 = vmul.f32 %v1673_v35, %v622_v61  ;;  %v944_v25 = vmul.f32 %v1673_v35, %v430_v16  ;;  %v513_v32 = vmin.f32 %v2201_v6, 0.0  ;;  %v2253_v16 = vpop.f32.mrf.mxu0  ;;  %v1217_v10 = vadd.f32 -1.0, %v1671_v50 }
 0x121   :  { %v1677_v8 = vpop.eup %1676  ;;  %v768_v5 = vmul.f32 %v1675_v63, %v638_v11  ;;  %v960_v34 = vmul.f32 %v1675_v63, %v446_v31  ;;  %1686 = vpow2.f32 %v701_v59  ;;  %v433_v1 = vmax.f32 %v2223_v26, 0.0  ;;  %v2259_v31 = vpop.f32.mrf.mxu1 }
 0x122   :  { %v1390_v24 = vpack.c.bf16 %v752_v23, %v751_v14  ;;  %v976_v18 = vmul.f32 %v1673_v35, %v944_v25  ;;  %1688 = vpow2.f32 %v733_v21  ;;  %vm463_vm5 = vcmp.gt.f32.partialorder %v2124_v55, 0.0  ;;  %v2282_v40 = vpop.f32.mrf.mxu0 }
 0x123   :  { %v1430_v0 = vpack.c.bf16 %v768_v5, %v767_v4  ;;  %v992_v45 = vmul.f32 %v1675_v63, %v960_v34  ;;  %1690 = vpow2.f32 %v541_v60  ;;  %v573_v2 = vmul.f32 1.442695, %v513_v32  ;;  %v2285_v15 = vpop.f32.mrf.mxu1 }
 0x124   :  { %1530 = vst [vmem:[%s2416_s3 + $0x20] sm:$0xff] %v1390_v24   ;;  %v1470_v17 = vpack.c.bf16 %v976_v18, %v975_v44  ;;  %v449_v28 = vmax.f32 %v2229_v29, 0.0  ;;  %v1233_v33 = vadd.f32 -1.0, %v1677_v8  ;;  %v659_v36 = vmul.f32 %v1863_v30, %v433_v1  ;;  %v2298_v63 = vpop.f32.mrf.mxu0 }
 0x125   :  { %1538 = vst [vmem:[%s2416_s3 + $0x60] sm:$0xff] %v1430_v0   ;;  %v1510_v22 = vpack.c.bf16 %v992_v45, %v991_v19  ;;  %v498_v7 = vmin.f32 %v2244_v53, 0.0  ;;  %v514_v46 = vmin.f32 %v2248_v54, 0.0  ;;  %1692 = vpow2.f32 %v573_v2  ;;  %v2300_v21 = vpop.f32.mrf.mxu1 }
 0x126   :  { %1545 = vst [vmem:[%s2417_s4 + $0x20] sm:$0xff] %v1470_v17   ;;  %v675_v48 = vmul.f32 %v1863_v30, %v449_v28  ;;  %v434_v49 = vmax.f32 %v2253_v16, 0.0  ;;  %v450_v52 = vmax.f32 %v2259_v31, 0.0  ;;  %v623_v47 = vsel %vm463_vm5, %v2124_v55, %v1217_v10  ;;  %v2315_v0 = vpop.f32.mrf.mxu0 }
 0x127   :  { %1553 = vst [vmem:[%s2417_s4 + $0x60] sm:$0xff] %v1510_v22   ;;  %v1679_v43 = vpop.eup %1678  ;;  %v703_v61 = vmul.f32 1.442695, %v659_v36  ;;  %v543_v38 = vmul.f32 1.442695, %v498_v7  ;;  %vm479_vm6 = vcmp.gt.f32.partialorder %v2128_v3, 0.0  ;;  %v2319_v17 = vpop.f32.mrf.mxu1 }
 0x128   :  { %v735_v50 = vmul.f32 1.442695, %v675_v48  ;;  %v575_v62 = vmul.f32 1.442695, %v514_v46  ;;  %v660_v13 = vmul.f32 %v1863_v30, %v434_v49  ;;  %v639_v35 = vsel %vm479_vm6, %v2128_v3, %v1233_v33 }
 0x129   :  { %v1681_v56 = vpop.eup %1680  ;;  %vm464_vm7 = vcmp.gt.f32.partialorder %v2167_v39, 0.0  ;;  %1694 = vpow2.f32 %v703_v61  ;;  %v676_v55 = vmul.f32 %v1863_v30, %v450_v52  ;;  %v753_v4 = vmul.f32 %v1679_v43, %v623_v47  ;;  %v2329_v61 = vpop.f32.mrf.mxu0 }
 0x12a   :  { %v1683_v14 = vpop.eup %1682  ;;  %vm480_vm8 = vcmp.gt.f32.partialorder %v2171_v37, 0.0  ;;  %1696 = vpow2.f32 %v735_v50  ;;  %v499_v11 = vmin.f32 %v2282_v40, 0.0  ;;  %v705_v3 = vmul.f32 1.442695, %v660_v13 }
 0x12b   :  { %v1685_v23 = vpop.eup %1684  ;;  %v1218_v25 = vadd.f32 -1.0, %v1683_v14  ;;  %1698 = vpow2.f32 %v543_v38  ;;  %v737_v59 = vmul.f32 1.442695, %v676_v55  ;;  %v945_v8 = vmul.f32 %v1679_v43, %v431_v57 }
 0x12c   :  { %v769_v44 = vmul.f32 %v1681_v56, %v639_v35  ;;  %v1234_v5 = vadd.f32 -1.0, %v1685_v23  ;;  %1700 = vpow2.f32 %v575_v62  ;;  %v961_v34 = vmul.f32 %v1681_v56, %v447_v58  ;;  %v2335_v62 = vpop.f32.mrf.mxu1 }
 0x12d   :  { %v624_v60 = vsel %vm464_vm7, %v2167_v39, %v1218_v25  ;;  %1702 = vpow2.f32 %v705_v3  ;;  %v515_v19 = vmin.f32 %v2285_v15, 0.0  ;;  %v435_v12 = vmax.f32 %v2298_v63, 0.0 }
 0x12e   :  { %v1687_v24 = vpop.eup %1686  ;;  %v640_v18 = vsel %vm480_vm8, %v2171_v37, %v1234_v5  ;;  %1704 = vpow2.f32 %v737_v59  ;;  %v451_v57 = vmax.f32 %v2300_v21, 0.0  ;;  %v545_v45 = vmul.f32 1.442695, %v499_v11 }
 0x12f   :  { %v1689_v20 = vpop.eup %1688  ;;  %v754_v58 = vmul.f32 %v1687_v24, %v624_v60  ;;  %v946_v39 = vmul.f32 %v1687_v24, %v432_v42  ;;  %v577_v32 = vmul.f32 1.442695, %v515_v19  ;;  %v661_v2 = vmul.f32 %v1863_v30, %v435_v12 }
 0x130   :  { %v1691_v10 = vpop.eup %1690  ;;  %v770_v22 = vmul.f32 %v1689_v20, %v640_v18  ;;  %v962_v37 = vmul.f32 %v1689_v20, %v448_v41  ;;  %v677_v33 = vmul.f32 %v1863_v30, %v451_v57  ;;  %v977_v36 = vmul.f32 %v1679_v43, %v945_v8 }
 0x131   :  { %v1395_v51 = vpack.c.bf16 %v754_v58, %v753_v4  ;;  %v978_v42 = vmul.f32 %v1687_v24, %v946_v39  ;;  %v993_v7 = vmul.f32 %v1681_v56, %v961_v34  ;;  %v707_v47 = vmul.f32 1.442695, %v661_v2 }
 0x132   :  { %v1435_v46 = vpack.c.bf16 %v770_v22, %v769_v44  ;;  %v994_v48 = vmul.f32 %v1689_v20, %v962_v37  ;;  %v1693_v38 = vpop.eup %1692  ;;  %v1219_v41 = vadd.f32 -1.0, %v1691_v10  ;;  %1706 = vpow2.f32 %v545_v45 }
 0x133   :  { %1531 = vst [vmem:[%s2416_s3 + $0x28] sm:$0xff] %v1395_v51   ;;  %v1475_v9 = vpack.c.bf16 %v978_v42, %v977_v36  ;;  %v500_v50 = vmin.f32 %v2315_v0, 0.0  ;;  %v1235_v13 = vadd.f32 -1.0, %v1693_v38  ;;  %1708 = vpow2.f32 %v577_v32 }
 0x134   :  { %1539 = vst [vmem:[%s2416_s3 + $0x68] sm:$0xff] %v1435_v46   ;;  %v1515_v43 = vpack.c.bf16 %v994_v48, %v993_v7  ;;  %v739_v56 = vmul.f32 1.442695, %v677_v33  ;;  %v516_v55 = vmin.f32 %v2319_v17, 0.0  ;;  %v436_v14 = vmax.f32 %v2329_v61, 0.0 }
 0x135   :  { %1546 = vst [vmem:[%s2417_s4 + $0x28] sm:$0xff] %v1475_v9   ;;  %v547_v35 = vmul.f32 1.442695, %v500_v50  ;;  %vm465_vm9 = vcmp.gt.f32.partialorder %v2197_v27, 0.0  ;;  %vm481_vm10 = vcmp.gt.f32.partialorder %v2201_v6, 0.0  ;;  %1710 = vpow2.f32 %v707_v47 }
 0x136   :  { %v1695_v4 = vpop.eup %1694  ;;  %1554 = vst [vmem:[%s2417_s4 + $0x68] sm:$0xff] %v1515_v43   ;;  %v452_v11 = vmax.f32 %v2335_v62, 0.0  ;;  %v625_v25 = vsel %vm465_vm9, %v2197_v27, %v1219_v41  ;;  %vm466_vm11 = vcmp.gt.f32.partialorder %v2244_v53, 0.0  ;;  %v579_v3 = vmul.f32 1.442695, %v516_v55 }
 0x137   :  { %v1697_v23 = vpop.eup %1696  ;;  %1712 = vpow2.f32 %v547_v35  ;;  %v641_v8 = vsel %vm481_vm10, %v2201_v6, %v1235_v13  ;;  %v662_v44 = vmul.f32 %v1863_v30, %v436_v14  ;;  %v947_v27 = vmul.f32 %v1695_v4, %v433_v1 }
 0x138   :  { %v1699_v59 = vpop.eup %1698  ;;  %1714 = vpow2.f32 %v739_v56  ;;  %v678_v5 = vmul.f32 %v1863_v30, %v452_v11  ;;  %vm482_vm12 = vcmp.gt.f32.partialorder %v2248_v54, 0.0  ;;  %v963_v6 = vmul.f32 %v1697_v23, %v449_v28 }
 0x139   :  { %v1701_v34 = vpop.eup %1700  ;;  %v1220_v60 = vadd.f32 -1.0, %v1699_v59  ;;  %1716 = vpow2.f32 %v579_v3  ;;  %v709_v18 = vmul.f32 1.442695, %v662_v44  ;;  %v755_v39 = vmul.f32 %v1695_v4, %v625_v25 }
 0x13a   :  { %v1703_v19 = vpop.eup %1702  ;;  %v1236_v24 = vadd.f32 -1.0, %v1701_v34  ;;  %v741_v20 = vmul.f32 1.442695, %v678_v5  ;;  %v771_v45 = vmul.f32 %v1697_v23, %v641_v8  ;;  %v979_v28 = vmul.f32 %v1695_v4, %v947_v27 }
 0x13b   :  { %v1705_v58 = vpop.eup %1704  ;;  %v626_v30 = vsel %vm466_vm11, %v2244_v53, %v1220_v60  ;;  %v948_v26 = vmul.f32 %v1703_v19, %v434_v49  ;;  %1718 = vpow2.f32 %v709_v18  ;;  %v995_v37 = vmul.f32 %v1697_v23, %v963_v6 }
 0x13c   :  { %v642_v1 = vsel %vm482_vm12, %v2248_v54, %v1236_v24  ;;  %v756_v32 = vmul.f32 %v1703_v19, %v626_v30  ;;  %v964_v29 = vmul.f32 %v1705_v58, %v450_v52  ;;  %1720 = vpow2.f32 %v741_v20 }
 0x13d   :  { %v980_v10 = vmul.f32 %v1703_v19, %v948_v26  ;;  %v772_v22 = vmul.f32 %v1705_v58, %v642_v1  ;;  %vm467_vm13 = vcmp.gt.f32.partialorder %v2282_v40, 0.0  ;;  %vm468_vm14 = vcmp.gt.f32.partialorder %v2315_v0, 0.0 }
 0x13e   :  { %v1400_v2 = vpack.c.bf16 %v756_v32, %v755_v39  ;;  %v996_v33 = vmul.f32 %v1705_v58, %v964_v29  ;;  %vm483_vm15 = vcmp.gt.f32.partialorder %v2285_v15, 0.0  ;;  %vm484_vm0 = vcmp.gt.f32.partialorder %v2319_v17, 0.0 }
 0x13f   :  { %v1480_v36 = vpack.c.bf16 %v980_v10, %v979_v28  ;;  %v1440_v51 = vpack.c.bf16 %v772_v22, %v771_v45  ;;  %v1707_v53 = vpop.eup %1706 }
 0x140   :  { %1532 = vst [vmem:[%s2416_s3 + $0x30] sm:$0xff] %v1400_v2   ;;  %v1520_v54 = vpack.c.bf16 %v996_v33, %v995_v37  ;;  %v1709_v16 = vpop.eup %1708  ;;  %v1221_v49 = vadd.f32 -1.0, %v1707_v53 }
 0x141   :  { %1547 = vst [vmem:[%s2417_s4 + $0x30] sm:$0xff] %v1480_v36   ;;  %1540 = vst [vmem:[%s2416_s3 + $0x70] sm:$0xff] %v1440_v51   ;;  %v1237_v42 = vadd.f32 -1.0, %v1709_v16 }
 0x142   :  { %1555 = vst [vmem:[%s2417_s4 + $0x70] sm:$0xff] %v1520_v54   ;;  %v1711_v31 = vpop.eup %1710  ;;  %v627_v47 = vsel %vm467_vm13, %v2282_v40, %v1221_v49 }
 0x143   :  { %v643_v41 = vsel %vm483_vm15, %v2285_v15, %v1237_v42  ;;  %v949_v50 = vmul.f32 %v1711_v31, %v435_v12  ;;  %v757_v40 = vmul.f32 %v1711_v31, %v627_v47 }
 0x144   :  { %v1713_v52 = vpop.eup %1712 }
 0x145   :  { %v1715_v7 = vpop.eup %1714  ;;  %v1222_v46 = vadd.f32 -1.0, %v1713_v52  ;;  %v981_v63 = vmul.f32 %v1711_v31, %v949_v50 }
 0x146   :  { %v1717_v48 = vpop.eup %1716  ;;  %v965_v13 = vmul.f32 %v1715_v7, %v451_v57  ;;  %v773_v4 = vmul.f32 %v1715_v7, %v643_v41 }
 0x147   :  { %v628_v38 = vsel %vm468_vm14, %v2315_v0, %v1222_v46  ;;  %v1238_v9 = vadd.f32 -1.0, %v1717_v48 }
 0x148   :  { %v1719_v43 = vpop.eup %1718  ;;  %v997_v3 = vmul.f32 %v1715_v7, %v965_v13 }
 0x149   :  { %v644_v56 = vsel %vm484_vm0, %v2319_v17, %v1238_v9  ;;  %v1721_v35 = vpop.eup %1720  ;;  %v758_v55 = vmul.f32 %v1719_v43, %v628_v38  ;;  %v950_v0 = vmul.f32 %v1719_v43, %v436_v14 }
 0x14a   :  { %v774_v23 = vmul.f32 %v1721_v35, %v644_v56  ;;  %v966_v15 = vmul.f32 %v1721_v35, %v452_v11 }
 0x14b   :  { %v1405_v12 = vpack.c.bf16 %v758_v55, %v757_v40  ;;  %v982_v25 = vmul.f32 %v1719_v43, %v950_v0 }
 0x14c   :  { %v1445_v59 = vpack.c.bf16 %v774_v23, %v773_v4  ;;  %v998_v21 = vmul.f32 %v1721_v35, %v966_v15 }
 0x14d   :  { %1533 = vst [vmem:[%s2416_s3 + $0x38] sm:$0xff] %v1405_v12   ;;  %v1485_v57 = vpack.c.bf16 %v982_v25, %v981_v63 }
 0x14e   :  { %1541 = vst [vmem:[%s2416_s3 + $0x78] sm:$0xff] %v1445_v59   ;;  %v1525_v17 = vpack.c.bf16 %v998_v21, %v997_v3 }
 0x14f   :  { %1548 = vst [vmem:[%s2417_s4 + $0x38] sm:$0xff] %v1485_v57  }
 0x150   :  { %1556 = vst [vmem:[%s2417_s4 + $0x78] sm:$0xff] %v1525_v17  }

// kernel: ggcl_d_forward.3
= control target key start
LH: loop header
LB: loop body
LE: loop exit
PB: predicated region body
PF: predicated region fallthrough
CT: control target
= control target key end

     0   :  { %s2209_s2 = inlined_call_operand.vmem [shape: bf16[256,128], index: 2, kind: input, shape index: {}]   ;;  %s2210_s3 = inlined_call_operand.vmem [shape: bf16[256,128], index: 3, kind: input, shape index: {}]   ;;  %s2211_s0 = inlined_call_operand.vmem [shape: bf16[256,256], index: 0, kind: input, shape index: {}]   ;;  %s2212_s1 = inlined_call_operand.vmem [shape: bf16[256,256], index: 1, kind: input, shape index: {}]   ;;  %s2213_s4 = inlined_call_operand.vmem [shape: f32[256,128], index: 4, kind: output, shape index: {0}]   ;;  %s2214_s5 = inlined_call_operand.vmem [shape: f32[256,128], index: 5, kind: output, shape index: {1}]  }
   0x1   :  { %v1571_v0 = vld [vmem:[%s2209_s2 + $0x78] sm:$0xff]   ;;  %v1575_v4 = vld [vmem:[%s2209_s2 + $0x70] sm:$0xff]   ;;  %v1579_v8 = vld [vmem:[%s2209_s2 + $0x68] sm:$0xff]  }
   0x2   :  { %v1572_v1 = vld [vmem:[%s2210_s3 + $0x78] sm:$0xff]   ;;  %1346 = vmatprep.subr.bf16.mxu0 %v1571_v0  ;;  %v1576_v5 = vld [vmem:[%s2210_s3 + $0x70] sm:$0xff]   ;;  %v1580_v9 = vld [vmem:[%s2210_s3 + $0x68] sm:$0xff]  }
   0x3   :  { %v1573_v2 = vld [vmem:[%s2209_s2 + $0x38] sm:$0xff]   ;;  %1458 = vmatprep.subr.bf16.mxu1 %v1572_v1  ;;  %v1577_v6 = vld [vmem:[%s2209_s2 + $0x30] sm:$0xff]   ;;  %v1581_v10 = vld [vmem:[%s2209_s2 + $0x28] sm:$0xff]  }
   0x4   :  { %v1574_v3 = vld [vmem:[%s2210_s3 + $0x38] sm:$0xff]   ;;  %1347 = vmatpush3.bf16.msra.mxu0 %v1573_v2  ;;  %v1578_v7 = vld [vmem:[%s2210_s3 + $0x30] sm:$0xff]   ;;  %v1582_v11 = vld [vmem:[%s2210_s3 + $0x28] sm:$0xff]  }
   0x5   :  { %1459 = vmatpush3.bf16.msra.mxu1 %v1574_v3  ;;  %1348 = vmatprep.subr.bf16.mxu0 %v1575_v4  ;;  %v1583_v12 = vld [vmem:[%s2209_s2 + $0x60] sm:$0xff]   ;;  %v1587_v16 = vld [vmem:[%s2209_s2 + $0x58] sm:$0xff]   ;;  %v1591_v20 = vld [vmem:[%s2209_s2 + $0x50] sm:$0xff]  }
   0x6   :  { %1460 = vmatprep.subr.bf16.mxu1 %v1576_v5  ;;  %v1584_v13 = vld [vmem:[%s2210_s3 + $0x60] sm:$0xff]   ;;  %v1588_v17 = vld [vmem:[%s2210_s3 + $0x58] sm:$0xff]   ;;  %v1592_v21 = vld [vmem:[%s2210_s3 + $0x50] sm:$0xff]  }
   0x7   :  { %v1585_v14 = vld [vmem:[%s2209_s2 + $0x20] sm:$0xff]   ;;  %v1589_v18 = vld [vmem:[%s2209_s2 + $0x18] sm:$0xff]   ;;  %v1593_v22 = vld [vmem:[%s2209_s2 + $0x10] sm:$0xff]  }
   0x8   :  { %1349 = vmatpush3.bf16.msra.mxu0 %v1577_v6  ;;  %v1586_v15 = vld [vmem:[%s2210_s3 + $0x20] sm:$0xff]   ;;  %v1590_v19 = vld [vmem:[%s2210_s3 + $0x18] sm:$0xff]   ;;  %v1594_v23 = vld [vmem:[%s2210_s3 + $0x10] sm:$0xff]  }
   0x9   :  { %1461 = vmatpush3.bf16.msra.mxu1 %v1578_v7  ;;  %1350 = vmatprep.subr.bf16.mxu0 %v1579_v8  ;;  %v1595_v24 = vld [vmem:[%s2209_s2 + $0x48] sm:$0xff]   ;;  %v1599_v28 = vld [vmem:[%s2209_s2 + $0x40] sm:$0xff]   ;;  %v1609_v36 = vld [vmem:[%s2211_s0 + $0x14] ss:$8 sps:$4 sm:$0xff]  }
   0xa   :  { %1462 = vmatprep.subr.bf16.mxu1 %v1580_v9  ;;  %v1596_v25 = vld [vmem:[%s2210_s3 + $0x48] sm:$0xff]   ;;  %v1600_v29 = vld [vmem:[%s2210_s3 + $0x40] sm:$0xff]   ;;  %v1611_v37 = vld [vmem:[%s2212_s1 + $0x14] ss:$8 sps:$4 sm:$0xff]  }
   0xb   :  { %v1597_v26 = vld [vmem:[%s2209_s2 + $0x8] sm:$0xff]   ;;  %v1601_v30 = vld [vmem:[%s2209_s2] sm:$0xff]   ;;  %v1613_v38 = vld [vmem:[%s2211_s0 + $0x10] ss:$8 sps:$4 sm:$0xff]  }
   0xc   :  { %1351 = vmatpush3.bf16.msra.mxu0 %v1581_v10  ;;  %v1598_v27 = vld [vmem:[%s2210_s3 + $0x8] sm:$0xff]   ;;  %v1602_v31 = vld [vmem:[%s2210_s3] sm:$0xff]   ;;  %v1614_v39 = vld [vmem:[%s2212_s1 + $0x10] ss:$8 sps:$4 sm:$0xff]  }
   0xd   :  { %1463 = vmatpush3.bf16.msra.mxu1 %v1582_v11  ;;  %1352 = vmatprep.subr.bf16.mxu0 %v1583_v12  ;;  %v1603_v32 = vld [vmem:[%s2211_s0] ss:$8 sps:$4 sm:$0xff]   ;;  %v1605_v33 = vld [vmem:[%s2211_s0 + $0x4] ss:$8 sps:$4 sm:$0xff]   ;;  %v1621_v44 = vld [vmem:[%s2211_s0 + $0x34] ss:$8 sps:$4 sm:$0xff]  }
   0xe   :  { %1464 = vmatprep.subr.bf16.mxu1 %v1584_v13  ;;  %v1606_v34 = vld [vmem:[%s2212_s1] ss:$8 sps:$4 sm:$0xff]   ;;  %v1608_v35 = vld [vmem:[%s2212_s1 + $0x4] ss:$8 sps:$4 sm:$0xff]   ;;  %472 = vmatprep.mubr.bf16.mxu0 %v1605_v33  ;;  %v1623_v45 = vld [vmem:[%s2212_s1 + $0x34] ss:$8 sps:$4 sm:$0xff]  }
   0xf   :  { %1049 = vmatprep.mubr.bf16.mxu1 %v1608_v35  ;;  %v1615_v40 = vld [vmem:[%s2211_s0 + $0x24] ss:$8 sps:$4 sm:$0xff]   ;;  %v1619_v42 = vld [vmem:[%s2211_s0 + $0x20] ss:$8 sps:$4 sm:$0xff]   ;;  %v1625_v46 = vld [vmem:[%s2211_s0 + $0x30] ss:$8 sps:$4 sm:$0xff]  }
  0x10   :  { %1353 = vmatpush3.bf16.msra.mxu0 %v1585_v14  ;;  %v1617_v41 = vld [vmem:[%s2212_s1 + $0x24] ss:$8 sps:$4 sm:$0xff]   ;;  %v1620_v43 = vld [vmem:[%s2212_s1 + $0x20] ss:$8 sps:$4 sm:$0xff]   ;;  %v1626_v47 = vld [vmem:[%s2212_s1 + $0x30] ss:$8 sps:$4 sm:$0xff]  }
  0x11   :  { %1465 = vmatpush3.bf16.msra.mxu1 %v1586_v15  ;;  %1354 = vmatprep.subr.bf16.mxu0 %v1587_v16  ;;  %v1627_v48 = vld [vmem:[%s2211_s0 + $0x44] ss:$8 sps:$4 sm:$0xff]   ;;  %v1631_v50 = vld [vmem:[%s2211_s0 + $0x40] ss:$8 sps:$4 sm:$0xff]   ;;  %v1633_v52 = vld [vmem:[%s2211_s0 + $0x54] ss:$8 sps:$4 sm:$0xff]  }
  0x12   :  { %1466 = vmatprep.subr.bf16.mxu1 %v1588_v17  ;;  %v1629_v49 = vld [vmem:[%s2212_s1 + $0x44] ss:$8 sps:$4 sm:$0xff]   ;;  %v1632_v51 = vld [vmem:[%s2212_s1 + $0x40] ss:$8 sps:$4 sm:$0xff]   ;;  %v1635_v53 = vld [vmem:[%s2212_s1 + $0x54] ss:$8 sps:$4 sm:$0xff]  }
  0x13   :  { %v1637_v54 = vld [vmem:[%s2211_s0 + $0x50] ss:$8 sps:$4 sm:$0xff]   ;;  %v1639_v56 = vld [vmem:[%s2211_s0 + $0x64] ss:$8 sps:$4 sm:$0xff]   ;;  %v1643_v58 = vld [vmem:[%s2211_s0 + $0x60] ss:$8 sps:$4 sm:$0xff]  }
  0x14   :  { %1355 = vmatpush3.bf16.msra.mxu0 %v1589_v18  ;;  %v1638_v55 = vld [vmem:[%s2212_s1 + $0x50] ss:$8 sps:$4 sm:$0xff]   ;;  %v1641_v57 = vld [vmem:[%s2212_s1 + $0x64] ss:$8 sps:$4 sm:$0xff]   ;;  %v1644_v59 = vld [vmem:[%s2212_s1 + $0x60] ss:$8 sps:$4 sm:$0xff]  }
  0x15   :  { %1467 = vmatpush3.bf16.msra.mxu1 %v1590_v19  ;;  %1356 = vmatprep.subr.bf16.mxu0 %v1591_v20  ;;  %v1645_v60 = vld [vmem:[%s2211_s0 + $0x74] ss:$8 sps:$4 sm:$0xff]   ;;  %v1649_v62 = vld [vmem:[%s2211_s0 + $0x70] ss:$8 sps:$4 sm:$0xff]   ;;  %v1651_v0 = vld [vmem:[%s2211_s0 + $0x84] ss:$8 sps:$4 sm:$0xff]  }
  0x16   :  { %1468 = vmatprep.subr.bf16.mxu1 %v1592_v21  ;;  %v1647_v61 = vld [vmem:[%s2212_s1 + $0x74] ss:$8 sps:$4 sm:$0xff]   ;;  %v1650_v63 = vld [vmem:[%s2212_s1 + $0x70] ss:$8 sps:$4 sm:$0xff]   ;;  %v1653_v1 = vld [vmem:[%s2212_s1 + $0x84] ss:$8 sps:$4 sm:$0xff]  }
  0x17   :  { %v1655_v2 = vld [vmem:[%s2211_s0 + $0x80] ss:$8 sps:$4 sm:$0xff]   ;;  %v1657_v4 = vld [vmem:[%s2211_s0 + $0x94] ss:$8 sps:$4 sm:$0xff]   ;;  %v1661_v6 = vld [vmem:[%s2211_s0 + $0x90] ss:$8 sps:$4 sm:$0xff]  }
  0x18   :  { %1357 = vmatpush3.bf16.msra.mxu0 %v1593_v22  ;;  %v1656_v3 = vld [vmem:[%s2212_s1 + $0x80] ss:$8 sps:$4 sm:$0xff]   ;;  %v1659_v5 = vld [vmem:[%s2212_s1 + $0x94] ss:$8 sps:$4 sm:$0xff]   ;;  %v1662_v7 = vld [vmem:[%s2212_s1 + $0x90] ss:$8 sps:$4 sm:$0xff]  }
  0x19   :  { %1469 = vmatpush3.bf16.msra.mxu1 %v1594_v23  ;;  %1358 = vmatprep.subr.bf16.mxu0 %v1595_v24  ;;  %v1663_v8 = vld [vmem:[%s2211_s0 + $0xa4] ss:$8 sps:$4 sm:$0xff]   ;;  %v1667_v10 = vld [vmem:[%s2211_s0 + $0xa0] ss:$8 sps:$4 sm:$0xff]   ;;  %v1669_v12 = vld [vmem:[%s2211_s0 + $0xb4] ss:$8 sps:$4 sm:$0xff]  }
  0x1a   :  { %1470 = vmatprep.subr.bf16.mxu1 %v1596_v25  ;;  %v1665_v9 = vld [vmem:[%s2212_s1 + $0xa4] ss:$8 sps:$4 sm:$0xff]   ;;  %v1668_v11 = vld [vmem:[%s2212_s1 + $0xa0] ss:$8 sps:$4 sm:$0xff]   ;;  %v1671_v13 = vld [vmem:[%s2212_s1 + $0xb4] ss:$8 sps:$4 sm:$0xff]  }
  0x1b   :  { %v1673_v14 = vld [vmem:[%s2211_s0 + $0xb0] ss:$8 sps:$4 sm:$0xff]   ;;  %v1675_v16 = vld [vmem:[%s2211_s0 + $0xc4] ss:$8 sps:$4 sm:$0xff]   ;;  %v1679_v18 = vld [vmem:[%s2211_s0 + $0xc0] ss:$8 sps:$4 sm:$0xff]  }
  0x1c   :  { %1359 = vmatpush3.bf16.msra.mxu0 %v1597_v26  ;;  %v1674_v15 = vld [vmem:[%s2212_s1 + $0xb0] ss:$8 sps:$4 sm:$0xff]   ;;  %v1677_v17 = vld [vmem:[%s2212_s1 + $0xc4] ss:$8 sps:$4 sm:$0xff]   ;;  %v1680_v19 = vld [vmem:[%s2212_s1 + $0xc0] ss:$8 sps:$4 sm:$0xff]  }
  0x1d   :  { %1471 = vmatpush3.bf16.msra.mxu1 %v1598_v27  ;;  %1360 = vmatprep.subr.bf16.mxu0 %v1599_v28  ;;  %v1681_v20 = vld [vmem:[%s2211_s0 + $0xd4] ss:$8 sps:$4 sm:$0xff]   ;;  %v1685_v22 = vld [vmem:[%s2211_s0 + $0xd0] ss:$8 sps:$4 sm:$0xff]   ;;  %v1687_v24 = vld [vmem:[%s2211_s0 + $0xe4] ss:$8 sps:$4 sm:$0xff]  }
  0x1e   :  { %1472 = vmatprep.subr.bf16.mxu1 %v1600_v29  ;;  %v1683_v21 = vld [vmem:[%s2212_s1 + $0xd4] ss:$8 sps:$4 sm:$0xff]   ;;  %v1686_v23 = vld [vmem:[%s2212_s1 + $0xd0] ss:$8 sps:$4 sm:$0xff]   ;;  %v1689_v25 = vld [vmem:[%s2212_s1 + $0xe4] ss:$8 sps:$4 sm:$0xff]  }
  0x1f   :  { %v1691_v26 = vld [vmem:[%s2211_s0 + $0xe0] ss:$8 sps:$4 sm:$0xff]   ;;  %v1693_v28 = vld [vmem:[%s2211_s0 + $0xf4] ss:$8 sps:$4 sm:$0xff]  }
  0x20   :  { %1361 = vmatpush3.bf16.msra.mxu0 %v1601_v30  ;;  %v1692_v27 = vld [vmem:[%s2212_s1 + $0xe0] ss:$8 sps:$4 sm:$0xff]   ;;  %v1695_v29 = vld [vmem:[%s2212_s1 + $0xf4] ss:$8 sps:$4 sm:$0xff]   ;;  %v1697_v30 = vld [vmem:[%s2211_s0 + $0xf0] ss:$8 sps:$4 sm:$0xff]  }
  0x21   :  { %1473 = vmatpush3.bf16.msra.mxu1 %v1602_v31  ;;  %v1698_v31 = vld [vmem:[%s2212_s1 + $0xf0] ss:$8 sps:$4 sm:$0xff]  }
  0x23   :  { %473 = vmatmul.mubr.bf16.vlgmr.msra.gmra.mxu0 %v1603_v32 }
  0x24   :  { %1050 = vmatmul.mubr.bf16.vlgmr.msra.gmra.mxu1 %v1606_v34  ;;  %480 = vmatprep.mubr.bf16.mxu0 %v1609_v36 }
  0x25   :  { %1057 = vmatprep.mubr.bf16.mxu1 %v1611_v37 }
  0x2b   :  { %481 = vmatmul.mubr.bf16.gmra.mxu0 %v1613_v38 }
  0x2c   :  { %1058 = vmatmul.mubr.bf16.gmra.mxu1 %v1614_v39  ;;  %488 = vmatprep.mubr.bf16.mxu0 %v1615_v40 }
  0x2d   :  { %1065 = vmatprep.mubr.bf16.mxu1 %v1617_v41 }
  0x33   :  { %489 = vmatmul.mubr.bf16.gmra.mxu0 %v1619_v42 }
  0x34   :  { %1066 = vmatmul.mubr.bf16.gmra.mxu1 %v1620_v43  ;;  %496 = vmatprep.mubr.bf16.mxu0 %v1621_v44 }
  0x35   :  { %1073 = vmatprep.mubr.bf16.mxu1 %v1623_v45 }
  0x3b   :  { %497 = vmatmul.mubr.bf16.gmra.mxu0 %v1625_v46 }
  0x3c   :  { %1074 = vmatmul.mubr.bf16.gmra.mxu1 %v1626_v47  ;;  %504 = vmatprep.mubr.bf16.mxu0 %v1627_v48 }
  0x3d   :  { %1081 = vmatprep.mubr.bf16.mxu1 %v1629_v49 }
  0x43   :  { %505 = vmatmul.mubr.bf16.gmra.mxu0 %v1631_v50 }
  0x44   :  { %1082 = vmatmul.mubr.bf16.gmra.mxu1 %v1632_v51  ;;  %512 = vmatprep.mubr.bf16.mxu0 %v1633_v52 }
  0x45   :  { %1089 = vmatprep.mubr.bf16.mxu1 %v1635_v53 }
  0x4b   :  { %513 = vmatmul.mubr.bf16.gmra.mxu0 %v1637_v54 }
  0x4c   :  { %1090 = vmatmul.mubr.bf16.gmra.mxu1 %v1638_v55  ;;  %520 = vmatprep.mubr.bf16.mxu0 %v1639_v56 }
  0x4d   :  { %1097 = vmatprep.mubr.bf16.mxu1 %v1641_v57 }
  0x53   :  { %521 = vmatmul.mubr.bf16.gmra.mxu0 %v1643_v58 }
  0x54   :  { %1098 = vmatmul.mubr.bf16.gmra.mxu1 %v1644_v59  ;;  %528 = vmatprep.mubr.bf16.mxu0 %v1645_v60 }
  0x55   :  { %1105 = vmatprep.mubr.bf16.mxu1 %v1647_v61 }
  0x5b   :  { %529 = vmatmul.mubr.bf16.gmra.mxu0 %v1649_v62 }
  0x5c   :  { %1106 = vmatmul.mubr.bf16.gmra.mxu1 %v1650_v63  ;;  %536 = vmatprep.mubr.bf16.mxu0 %v1651_v0 }
  0x5d   :  { %1113 = vmatprep.mubr.bf16.mxu1 %v1653_v1 }
  0x63   :  { %537 = vmatmul.mubr.bf16.gmra.mxu0 %v1655_v2 }
  0x64   :  { %1114 = vmatmul.mubr.bf16.gmra.mxu1 %v1656_v3  ;;  %544 = vmatprep.mubr.bf16.mxu0 %v1657_v4 }
  0x65   :  { %1121 = vmatprep.mubr.bf16.mxu1 %v1659_v5 }
  0x6b   :  { %545 = vmatmul.mubr.bf16.gmra.mxu0 %v1661_v6 }
  0x6c   :  { %1122 = vmatmul.mubr.bf16.gmra.mxu1 %v1662_v7  ;;  %552 = vmatprep.mubr.bf16.mxu0 %v1663_v8 }
  0x6d   :  { %1129 = vmatprep.mubr.bf16.mxu1 %v1665_v9 }
  0x73   :  { %553 = vmatmul.mubr.bf16.gmra.mxu0 %v1667_v10 }
  0x74   :  { %1130 = vmatmul.mubr.bf16.gmra.mxu1 %v1668_v11  ;;  %560 = vmatprep.mubr.bf16.mxu0 %v1669_v12 }
  0x75   :  { %1137 = vmatprep.mubr.bf16.mxu1 %v1671_v13 }
  0x7b   :  { %561 = vmatmul.mubr.bf16.gmra.mxu0 %v1673_v14 }
  0x7c   :  { %1138 = vmatmul.mubr.bf16.gmra.mxu1 %v1674_v15  ;;  %568 = vmatprep.mubr.bf16.mxu0 %v1675_v16 }
  0x7d   :  { %1145 = vmatprep.mubr.bf16.mxu1 %v1677_v17 }
  0x83   :  { %569 = vmatmul.mubr.bf16.gmra.mxu0 %v1679_v18 }
  0x84   :  { %1146 = vmatmul.mubr.bf16.gmra.mxu1 %v1680_v19  ;;  %576 = vmatprep.mubr.bf16.mxu0 %v1681_v20 }
  0x85   :  { %1153 = vmatprep.mubr.bf16.mxu1 %v1683_v21 }
  0x8b   :  { %577 = vmatmul.mubr.bf16.gmra.mxu0 %v1685_v22 }
  0x8c   :  { %1154 = vmatmul.mubr.bf16.gmra.mxu1 %v1686_v23  ;;  %584 = vmatprep.mubr.bf16.mxu0 %v1687_v24 }
  0x8d   :  { %1161 = vmatprep.mubr.bf16.mxu1 %v1689_v25 }
  0x93   :  { %585 = vmatmul.mubr.bf16.gmra.mxu0 %v1691_v26 }
  0x94   :  { %1162 = vmatmul.mubr.bf16.gmra.mxu1 %v1692_v27  ;;  %592 = vmatprep.mubr.bf16.mxu0 %v1693_v28 }
  0x95   :  { %1169 = vmatprep.mubr.bf16.mxu1 %v1695_v29 }
  0x9b   :  { %593 = vmatmul.mubr.bf16.gmra.mxu0 %v1697_v30 }
  0x9c   :  { %1170 = vmatmul.mubr.bf16.gmra.mxu1 %v1698_v31 }
  0xe3   :  { %v1362_v32 = vpop.f32.mrf.mxu0 }
  0xe4   :  { %v1474_v33 = vpop.f32.mrf.mxu1 }
  0xe5   :  { %v1363_v34 = vpop.f32.mrf.mxu0 }
  0xe6   :  { %v1364_v35 = vadd.f32 %v1363_v34, %v1362_v32  ;;  %v1475_v36 = vpop.f32.mrf.mxu1 }
  0xe7   :  { %v1476_v37 = vadd.f32 %v1475_v36, %v1474_v33  ;;  %v1365_v38 = vpop.f32.mrf.mxu0 }
  0xe8   :  { %v1477_v39 = vpop.f32.mrf.mxu1  ;;  %633 = vst [vmem:[%s2213_s4] sm:$0xff] %v1364_v35 }
  0xe9   :  { %v1366_v40 = vpop.f32.mrf.mxu0  ;;  %1210 = vst [vmem:[%s2214_s5] sm:$0xff] %v1476_v37 }
  0xea   :  { %v1367_v41 = vadd.f32 %v1366_v40, %v1365_v38  ;;  %v1478_v42 = vpop.f32.mrf.mxu1 }
  0xeb   :  { %v1479_v43 = vadd.f32 %v1478_v42, %v1477_v39  ;;  %v1368_v44 = vpop.f32.mrf.mxu0 }
  0xec   :  { %v1480_v45 = vpop.f32.mrf.mxu1  ;;  %634 = vst [vmem:[%s2213_s4 + $0x8] sm:$0xff] %v1367_v41 }
  0xed   :  { %v1369_v46 = vpop.f32.mrf.mxu0  ;;  %1211 = vst [vmem:[%s2214_s5 + $0x8] sm:$0xff] %v1479_v43 }
  0xee   :  { %v1370_v47 = vadd.f32 %v1369_v46, %v1368_v44  ;;  %v1481_v48 = vpop.f32.mrf.mxu1 }
  0xef   :  { %v1482_v49 = vadd.f32 %v1481_v48, %v1480_v45  ;;  %v1371_v50 = vpop.f32.mrf.mxu0 }
  0xf0   :  { %v1483_v51 = vpop.f32.mrf.mxu1  ;;  %635 = vst [vmem:[%s2213_s4 + $0x10] sm:$0xff] %v1370_v47 }
  0xf1   :  { %v1372_v52 = vpop.f32.mrf.mxu0  ;;  %1212 = vst [vmem:[%s2214_s5 + $0x10] sm:$0xff] %v1482_v49 }
  0xf2   :  { %v1373_v53 = vadd.f32 %v1372_v52, %v1371_v50  ;;  %v1484_v54 = vpop.f32.mrf.mxu1 }
  0xf3   :  { %v1485_v55 = vadd.f32 %v1484_v54, %v1483_v51  ;;  %v1374_v56 = vpop.f32.mrf.mxu0 }
  0xf4   :  { %v1486_v57 = vpop.f32.mrf.mxu1  ;;  %636 = vst [vmem:[%s2213_s4 + $0x18] sm:$0xff] %v1373_v53 }
  0xf5   :  { %v1375_v58 = vpop.f32.mrf.mxu0  ;;  %1213 = vst [vmem:[%s2214_s5 + $0x18] sm:$0xff] %v1485_v55 }
  0xf6   :  { %v1376_v59 = vadd.f32 %v1375_v58, %v1374_v56  ;;  %v1487_v60 = vpop.f32.mrf.mxu1 }
  0xf7   :  { %v1488_v61 = vadd.f32 %v1487_v60, %v1486_v57  ;;  %v1377_v62 = vpop.f32.mrf.mxu0 }
  0xf8   :  { %v1489_v63 = vpop.f32.mrf.mxu1  ;;  %637 = vst [vmem:[%s2213_s4 + $0x20] sm:$0xff] %v1376_v59 }
  0xf9   :  { %v1378_v0 = vpop.f32.mrf.mxu0  ;;  %1214 = vst [vmem:[%s2214_s5 + $0x20] sm:$0xff] %v1488_v61 }
  0xfa   :  { %v1379_v1 = vadd.f32 %v1378_v0, %v1377_v62  ;;  %v1490_v2 = vpop.f32.mrf.mxu1 }
  0xfb   :  { %v1491_v3 = vadd.f32 %v1490_v2, %v1489_v63  ;;  %v1380_v4 = vpop.f32.mrf.mxu0 }
  0xfc   :  { %v1492_v5 = vpop.f32.mrf.mxu1  ;;  %638 = vst [vmem:[%s2213_s4 + $0x28] sm:$0xff] %v1379_v1 }
  0xfd   :  { %v1381_v6 = vpop.f32.mrf.mxu0  ;;  %1215 = vst [vmem:[%s2214_s5 + $0x28] sm:$0xff] %v1491_v3 }
  0xfe   :  { %v1382_v7 = vadd.f32 %v1381_v6, %v1380_v4  ;;  %v1493_v8 = vpop.f32.mrf.mxu1 }
  0xff   :  { %v1494_v9 = vadd.f32 %v1493_v8, %v1492_v5  ;;  %v1383_v10 = vpop.f32.mrf.mxu0 }
 0x100   :  { %v1495_v11 = vpop.f32.mrf.mxu1  ;;  %639 = vst [vmem:[%s2213_s4 + $0x30] sm:$0xff] %v1382_v7 }
 0x101   :  { %v1384_v12 = vpop.f32.mrf.mxu0  ;;  %1216 = vst [vmem:[%s2214_s5 + $0x30] sm:$0xff] %v1494_v9 }
 0x102   :  { %v1385_v13 = vadd.f32 %v1384_v12, %v1383_v10  ;;  %v1496_v14 = vpop.f32.mrf.mxu1 }
 0x103   :  { %v1497_v15 = vadd.f32 %v1496_v14, %v1495_v11  ;;  %v1386_v16 = vpop.f32.mrf.mxu0 }
 0x104   :  { %v1498_v17 = vpop.f32.mrf.mxu1  ;;  %640 = vst [vmem:[%s2213_s4 + $0x38] sm:$0xff] %v1385_v13 }
 0x105   :  { %v1387_v18 = vpop.f32.mrf.mxu0  ;;  %1217 = vst [vmem:[%s2214_s5 + $0x38] sm:$0xff] %v1497_v15 }
 0x106   :  { %v1388_v19 = vadd.f32 %v1387_v18, %v1386_v16  ;;  %v1499_v20 = vpop.f32.mrf.mxu1 }
 0x107   :  { %v1500_v21 = vadd.f32 %v1499_v20, %v1498_v17  ;;  %v1389_v22 = vpop.f32.mrf.mxu0 }
 0x108   :  { %v1501_v23 = vpop.f32.mrf.mxu1  ;;  %641 = vst [vmem:[%s2213_s4 + $0x40] sm:$0xff] %v1388_v19 }
 0x109   :  { %v1390_v24 = vpop.f32.mrf.mxu0  ;;  %1218 = vst [vmem:[%s2214_s5 + $0x40] sm:$0xff] %v1500_v21 }
 0x10a   :  { %v1391_v25 = vadd.f32 %v1390_v24, %v1389_v22  ;;  %v1502_v26 = vpop.f32.mrf.mxu1 }
 0x10b   :  { %v1503_v27 = vadd.f32 %v1502_v26, %v1501_v23  ;;  %v1392_v28 = vpop.f32.mrf.mxu0 }
 0x10c   :  { %v1504_v29 = vpop.f32.mrf.mxu1  ;;  %642 = vst [vmem:[%s2213_s4 + $0x48] sm:$0xff] %v1391_v25 }
 0x10d   :  { %v1393_v30 = vpop.f32.mrf.mxu0  ;;  %1219 = vst [vmem:[%s2214_s5 + $0x48] sm:$0xff] %v1503_v27 }
 0x10e   :  { %v1394_v31 = vadd.f32 %v1393_v30, %v1392_v28  ;;  %v1505_v32 = vpop.f32.mrf.mxu1 }
 0x10f   :  { %v1506_v33 = vadd.f32 %v1505_v32, %v1504_v29  ;;  %v1395_v34 = vpop.f32.mrf.mxu0 }
 0x110   :  { %v1507_v35 = vpop.f32.mrf.mxu1  ;;  %643 = vst [vmem:[%s2213_s4 + $0x50] sm:$0xff] %v1394_v31 }
 0x111   :  { %v1396_v36 = vpop.f32.mrf.mxu0  ;;  %1220 = vst [vmem:[%s2214_s5 + $0x50] sm:$0xff] %v1506_v33 }
 0x112   :  { %v1397_v37 = vadd.f32 %v1396_v36, %v1395_v34  ;;  %v1508_v38 = vpop.f32.mrf.mxu1 }
 0x113   :  { %v1509_v39 = vadd.f32 %v1508_v38, %v1507_v35  ;;  %v1398_v40 = vpop.f32.mrf.mxu0 }
 0x114   :  { %v1510_v41 = vpop.f32.mrf.mxu1  ;;  %644 = vst [vmem:[%s2213_s4 + $0x58] sm:$0xff] %v1397_v37 }
 0x115   :  { %v1399_v42 = vpop.f32.mrf.mxu0  ;;  %1221 = vst [vmem:[%s2214_s5 + $0x58] sm:$0xff] %v1509_v39 }
 0x116   :  { %v1400_v43 = vadd.f32 %v1399_v42, %v1398_v40  ;;  %v1511_v44 = vpop.f32.mrf.mxu1 }
 0x117   :  { %v1512_v45 = vadd.f32 %v1511_v44, %v1510_v41  ;;  %v1401_v46 = vpop.f32.mrf.mxu0 }
 0x118   :  { %v1513_v47 = vpop.f32.mrf.mxu1  ;;  %645 = vst [vmem:[%s2213_s4 + $0x60] sm:$0xff] %v1400_v43 }
 0x119   :  { %v1402_v48 = vpop.f32.mrf.mxu0  ;;  %1222 = vst [vmem:[%s2214_s5 + $0x60] sm:$0xff] %v1512_v45 }
 0x11a   :  { %v1403_v49 = vadd.f32 %v1402_v48, %v1401_v46  ;;  %v1514_v50 = vpop.f32.mrf.mxu1 }
 0x11b   :  { %v1515_v51 = vadd.f32 %v1514_v50, %v1513_v47  ;;  %v1404_v52 = vpop.f32.mrf.mxu0 }
 0x11c   :  { %v1516_v53 = vpop.f32.mrf.mxu1  ;;  %646 = vst [vmem:[%s2213_s4 + $0x68] sm:$0xff] %v1403_v49 }
 0x11d   :  { %v1405_v54 = vpop.f32.mrf.mxu0  ;;  %1223 = vst [vmem:[%s2214_s5 + $0x68] sm:$0xff] %v1515_v51 }
 0x11e   :  { %v1406_v55 = vadd.f32 %v1405_v54, %v1404_v52  ;;  %v1517_v56 = vpop.f32.mrf.mxu1 }
 0x11f   :  { %v1518_v57 = vadd.f32 %v1517_v56, %v1516_v53  ;;  %v1407_v58 = vpop.f32.mrf.mxu0 }
 0x120   :  { %v1519_v59 = vpop.f32.mrf.mxu1  ;;  %647 = vst [vmem:[%s2213_s4 + $0x70] sm:$0xff] %v1406_v55 }
 0x121   :  { %v1408_v60 = vpop.f32.mrf.mxu0  ;;  %1224 = vst [vmem:[%s2214_s5 + $0x70] sm:$0xff] %v1518_v57 }
 0x122   :  { %v1409_v61 = vadd.f32 %v1408_v60, %v1407_v58  ;;  %v1520_v62 = vpop.f32.mrf.mxu1 }
 0x123   :  { %v1521_v63 = vadd.f32 %v1520_v62, %v1519_v59  ;;  %v1410_v0 = vpop.f32.mrf.mxu0 }
 0x124   :  { %v1522_v1 = vpop.f32.mrf.mxu1  ;;  %648 = vst [vmem:[%s2213_s4 + $0x78] sm:$0xff] %v1409_v61 }
 0x125   :  { %v1411_v2 = vpop.f32.mrf.mxu0  ;;  %1225 = vst [vmem:[%s2214_s5 + $0x78] sm:$0xff] %v1521_v63 }
 0x126   :  { %v1412_v3 = vadd.f32 %v1411_v2, %v1410_v0  ;;  %v1523_v4 = vpop.f32.mrf.mxu1 }
 0x127   :  { %v1524_v5 = vadd.f32 %v1523_v4, %v1522_v1  ;;  %v1413_v6 = vpop.f32.mrf.mxu0 }
 0x128   :  { %v1525_v7 = vpop.f32.mrf.mxu1  ;;  %649 = vst [vmem:[%s2213_s4 + $0x80] sm:$0xff] %v1412_v3 }
 0x129   :  { %v1414_v8 = vpop.f32.mrf.mxu0  ;;  %1226 = vst [vmem:[%s2214_s5 + $0x80] sm:$0xff] %v1524_v5 }
 0x12a   :  { %v1415_v9 = vadd.f32 %v1414_v8, %v1413_v6  ;;  %v1526_v10 = vpop.f32.mrf.mxu1 }
 0x12b   :  { %v1527_v11 = vadd.f32 %v1526_v10, %v1525_v7  ;;  %v1416_v12 = vpop.f32.mrf.mxu0 }
 0x12c   :  { %v1528_v13 = vpop.f32.mrf.mxu1  ;;  %650 = vst [vmem:[%s2213_s4 + $0x88] sm:$0xff] %v1415_v9 }
 0x12d   :  { %v1417_v14 = vpop.f32.mrf.mxu0  ;;  %1227 = vst [vmem:[%s2214_s5 + $0x88] sm:$0xff] %v1527_v11 }
 0x12e   :  { %v1418_v15 = vadd.f32 %v1417_v14, %v1416_v12  ;;  %v1529_v16 = vpop.f32.mrf.mxu1 }
 0x12f   :  { %v1530_v17 = vadd.f32 %v1529_v16, %v1528_v13  ;;  %v1419_v18 = vpop.f32.mrf.mxu0 }
 0x130   :  { %v1531_v19 = vpop.f32.mrf.mxu1  ;;  %651 = vst [vmem:[%s2213_s4 + $0x90] sm:$0xff] %v1418_v15 }
 0x131   :  { %v1420_v20 = vpop.f32.mrf.mxu0  ;;  %1228 = vst [vmem:[%s2214_s5 + $0x90] sm:$0xff] %v1530_v17 }
 0x132   :  { %v1421_v21 = vadd.f32 %v1420_v20, %v1419_v18  ;;  %v1532_v22 = vpop.f32.mrf.mxu1 }
 0x133   :  { %v1533_v23 = vadd.f32 %v1532_v22, %v1531_v19  ;;  %v1422_v24 = vpop.f32.mrf.mxu0 }
 0x134   :  { %v1534_v25 = vpop.f32.mrf.mxu1  ;;  %652 = vst [vmem:[%s2213_s4 + $0x98] sm:$0xff] %v1421_v21 }
 0x135   :  { %v1423_v26 = vpop.f32.mrf.mxu0  ;;  %1229 = vst [vmem:[%s2214_s5 + $0x98] sm:$0xff] %v1533_v23 }
 0x136   :  { %v1424_v27 = vadd.f32 %v1423_v26, %v1422_v24  ;;  %v1535_v28 = vpop.f32.mrf.mxu1 }
 0x137   :  { %v1536_v29 = vadd.f32 %v1535_v28, %v1534_v25  ;;  %v1425_v30 = vpop.f32.mrf.mxu0 }
 0x138   :  { %v1537_v31 = vpop.f32.mrf.mxu1  ;;  %653 = vst [vmem:[%s2213_s4 + $0xa0] sm:$0xff] %v1424_v27 }
 0x139   :  { %v1426_v32 = vpop.f32.mrf.mxu0  ;;  %1230 = vst [vmem:[%s2214_s5 + $0xa0] sm:$0xff] %v1536_v29 }
 0x13a   :  { %v1427_v33 = vadd.f32 %v1426_v32, %v1425_v30  ;;  %v1538_v34 = vpop.f32.mrf.mxu1 }
 0x13b   :  { %v1539_v35 = vadd.f32 %v1538_v34, %v1537_v31  ;;  %v1428_v36 = vpop.f32.mrf.mxu0 }
 0x13c   :  { %v1540_v37 = vpop.f32.mrf.mxu1  ;;  %654 = vst [vmem:[%s2213_s4 + $0xa8] sm:$0xff] %v1427_v33 }
 0x13d   :  { %v1429_v38 = vpop.f32.mrf.mxu0  ;;  %1231 = vst [vmem:[%s2214_s5 + $0xa8] sm:$0xff] %v1539_v35 }
 0x13e   :  { %v1430_v39 = vadd.f32 %v1429_v38, %v1428_v36  ;;  %v1541_v40 = vpop.f32.mrf.mxu1 }
 0x13f   :  { %v1542_v41 = vadd.f32 %v1541_v40, %v1540_v37  ;;  %v1431_v42 = vpop.f32.mrf.mxu0 }
 0x140   :  { %v1543_v43 = vpop.f32.mrf.mxu1  ;;  %655 = vst [vmem:[%s2213_s4 + $0xb0] sm:$0xff] %v1430_v39 }
 0x141   :  { %v1432_v44 = vpop.f32.mrf.mxu0  ;;  %1232 = vst [vmem:[%s2214_s5 + $0xb0] sm:$0xff] %v1542_v41 }
 0x142   :  { %v1433_v45 = vadd.f32 %v1432_v44, %v1431_v42  ;;  %v1544_v46 = vpop.f32.mrf.mxu1 }
 0x143   :  { %v1545_v47 = vadd.f32 %v1544_v46, %v1543_v43  ;;  %v1434_v48 = vpop.f32.mrf.mxu0 }
 0x144   :  { %v1546_v49 = vpop.f32.mrf.mxu1  ;;  %656 = vst [vmem:[%s2213_s4 + $0xb8] sm:$0xff] %v1433_v45 }
 0x145   :  { %v1435_v50 = vpop.f32.mrf.mxu0  ;;  %1233 = vst [vmem:[%s2214_s5 + $0xb8] sm:$0xff] %v1545_v47 }
 0x146   :  { %v1436_v51 = vadd.f32 %v1435_v50, %v1434_v48  ;;  %v1547_v52 = vpop.f32.mrf.mxu1 }
 0x147   :  { %v1548_v53 = vadd.f32 %v1547_v52, %v1546_v49  ;;  %v1437_v54 = vpop.f32.mrf.mxu0 }
 0x148   :  { %v1549_v55 = vpop.f32.mrf.mxu1  ;;  %657 = vst [vmem:[%s2213_s4 + $0xc0] sm:$0xff] %v1436_v51 }
 0x149   :  { %v1438_v56 = vpop.f32.mrf.mxu0  ;;  %1234 = vst [vmem:[%s2214_s5 + $0xc0] sm:$0xff] %v1548_v53 }
 0x14a   :  { %v1439_v57 = vadd.f32 %v1438_v56, %v1437_v54  ;;  %v1550_v58 = vpop.f32.mrf.mxu1 }
 0x14b   :  { %v1551_v59 = vadd.f32 %v1550_v58, %v1549_v55  ;;  %v1440_v60 = vpop.f32.mrf.mxu0 }
 0x14c   :  { %v1552_v61 = vpop.f32.mrf.mxu1  ;;  %658 = vst [vmem:[%s2213_s4 + $0xc8] sm:$0xff] %v1439_v57 }
 0x14d   :  { %v1441_v62 = vpop.f32.mrf.mxu0  ;;  %1235 = vst [vmem:[%s2214_s5 + $0xc8] sm:$0xff] %v1551_v59 }
 0x14e   :  { %v1442_v63 = vadd.f32 %v1441_v62, %v1440_v60  ;;  %v1553_v0 = vpop.f32.mrf.mxu1 }
 0x14f   :  { %v1554_v1 = vadd.f32 %v1553_v0, %v1552_v61  ;;  %v1443_v2 = vpop.f32.mrf.mxu0 }
 0x150   :  { %v1555_v3 = vpop.f32.mrf.mxu1  ;;  %659 = vst [vmem:[%s2213_s4 + $0xd0] sm:$0xff] %v1442_v63 }
 0x151   :  { %v1444_v4 = vpop.f32.mrf.mxu0  ;;  %1236 = vst [vmem:[%s2214_s5 + $0xd0] sm:$0xff] %v1554_v1 }
 0x152   :  { %v1445_v5 = vadd.f32 %v1444_v4, %v1443_v2  ;;  %v1556_v6 = vpop.f32.mrf.mxu1 }
 0x153   :  { %v1557_v7 = vadd.f32 %v1556_v6, %v1555_v3  ;;  %v1446_v8 = vpop.f32.mrf.mxu0 }
 0x154   :  { %v1558_v9 = vpop.f32.mrf.mxu1  ;;  %660 = vst [vmem:[%s2213_s4 + $0xd8] sm:$0xff] %v1445_v5 }
 0x155   :  { %v1447_v10 = vpop.f32.mrf.mxu0  ;;  %1237 = vst [vmem:[%s2214_s5 + $0xd8] sm:$0xff] %v1557_v7 }
 0x156   :  { %v1448_v11 = vadd.f32 %v1447_v10, %v1446_v8  ;;  %v1559_v12 = vpop.f32.mrf.mxu1 }
 0x157   :  { %v1560_v13 = vadd.f32 %v1559_v12, %v1558_v9  ;;  %v1449_v14 = vpop.f32.mrf.mxu0 }
 0x158   :  { %v1561_v15 = vpop.f32.mrf.mxu1  ;;  %661 = vst [vmem:[%s2213_s4 + $0xe0] sm:$0xff] %v1448_v11 }
 0x159   :  { %v1450_v16 = vpop.f32.mrf.mxu0  ;;  %1238 = vst [vmem:[%s2214_s5 + $0xe0] sm:$0xff] %v1560_v13 }
 0x15a   :  { %v1451_v17 = vadd.f32 %v1450_v16, %v1449_v14  ;;  %v1562_v18 = vpop.f32.mrf.mxu1 }
 0x15b   :  { %v1563_v19 = vadd.f32 %v1562_v18, %v1561_v15  ;;  %v1452_v20 = vpop.f32.mrf.mxu0 }
 0x15c   :  { %v1564_v21 = vpop.f32.mrf.mxu1  ;;  %662 = vst [vmem:[%s2213_s4 + $0xe8] sm:$0xff] %v1451_v17 }
 0x15d   :  { %v1453_v22 = vpop.f32.mrf.mxu0  ;;  %1239 = vst [vmem:[%s2214_s5 + $0xe8] sm:$0xff] %v1563_v19 }
 0x15e   :  { %v1454_v23 = vadd.f32 %v1453_v22, %v1452_v20  ;;  %v1565_v24 = vpop.f32.mrf.mxu1 }
 0x15f   :  { %v1566_v25 = vadd.f32 %v1565_v24, %v1564_v21  ;;  %v1455_v26 = vpop.f32.mrf.mxu0 }
 0x160   :  { %v1567_v27 = vpop.f32.mrf.mxu1  ;;  %663 = vst [vmem:[%s2213_s4 + $0xf0] sm:$0xff] %v1454_v23 }
 0x161   :  { %v1456_v28 = vpop.f32.mrf.mxu0  ;;  %1240 = vst [vmem:[%s2214_s5 + $0xf0] sm:$0xff] %v1566_v25 }
 0x162   :  { %v1457_v29 = vadd.f32 %v1456_v28, %v1455_v26  ;;  %v1568_v30 = vpop.f32.mrf.mxu1 }
 0x163   :  { %v1569_v31 = vadd.f32 %v1568_v30, %v1567_v27 }
 0x164   :  { %664 = vst [vmem:[%s2213_s4 + $0xf8] sm:$0xff] %v1457_v29 }
 0x165   :  { %1241 = vst [vmem:[%s2214_s5 + $0xf8] sm:$0xff] %v1569_v31 }

</bundles_post_ra>
